<compile_context>
chip_gen: v7x
topology: tpu7x:2x2x1
jax: 0.10.0
libtpu: 0.0.40
codegen_flags: <defaults>
</compile_context>

<pallas_src>
import math

import jax
import jax.numpy as jnp
from jax import lax
from jax.experimental import pallas as pl
from jax.experimental.pallas import tpu as pltpu

LANE = 128  # TPU vreg lane width; pad all feature dims to multiples of this.


def _round_up(x, m):
    return (x + m - 1) // m * m


def _device_kind():
    try:
        return jax.devices()[0].device_kind.lower()
    except Exception:
        return ""


def _default_batch_tile(kind):
    if "v5" in kind:
        return 128   # 4x128^2 MXU -> 128-row tiles
    if "v6" in kind:
        return 512   # 128 MiB VMEM: amortize per-step overhead, longer MXU bursts
    return 256       # v7x / unknown


def _usable_vmem_bytes(kind):
    cap = None
    try:
        cap = int(pltpu.get_tpu_info().vmem_capacity_bytes)
    except Exception:
        cap = None
    if not cap:
        if "v5" in kind or "v6" in kind:
            cap = 128 * 1024 * 1024
        else:
            cap = 64 * 1024 * 1024   # v7x per-TensorCore / conservative default
    return cap - max(8 * 1024 * 1024, cap // 8)   # leave compiler headroom


# ----------------------------------------------------------------------------
# Kernel: one batch tile.  Fused: gather embedding rows from HBM (per scalar-
# prefetched token id), mean over seq into a VMEM [TB, Ep] buffer, then the
# 4-layer MLP with bf16 matmul inputs and f32 MXU accumulation.
# ----------------------------------------------------------------------------
def mlp_kernel(tok_ref, emb_hbm,
               w1_ref, b1_ref, w2_ref, b2_ref, w3_ref, b3_ref, w4_ref, b4_ref,
               out_ref, row_buf, sem, x_vmem):
    cdt = w1_ref.dtype                    # compute/storage dtype (bf16)
    TB, Ep = x_vmem.shape
    S = tok_ref.shape[1]
    base = pl.program_id(0) * TB
    inv_s = 1.0 / S

    def fetch(b, s, slot):
        tok = tok_ref[base + b, s]
        pltpu.make_async_copy(emb_hbm.at[pl.ds(tok, 1)], row_buf.at[slot],
                              sem.at[slot]).start()

    def wait(slot):
        pltpu.make_async_copy(emb_hbm.at[pl.ds(0, 1)], row_buf.at[slot],
                              sem.at[slot]).wait()

    # ---- gather + mean over seq (double-buffered 1-row DMAs from HBM) ----
    def row_body(b, carry):
        fetch(b, 0, 0)

        def seq_body(s, acc):
            slot = s & 1
            wait(slot)

            @pl.when(s + 1 < S)
            def _():
                fetch(b, s + 1, 1 - slot)

            return acc + row_buf[slot]

        acc = lax.fori_loop(0, S, seq_body, jnp.zeros((1, Ep), jnp.float32))
        x_vmem[pl.ds(b, 1), :] = acc * inv_s
        return carry

    lax.fori_loop(0, TB, row_body, 0)

    # ---- 4-layer MLP (bf16 matmul inputs, f32 accumulation, f32 bias/ReLU) ----
    x = x_vmem[...].astype(cdt)                                   # [TB, Ep]
    h = jnp.dot(x, w1_ref[...], preferred_element_type=jnp.float32) + b1_ref[...]
    h = jnp.maximum(h, 0.0).astype(cdt)                           # bf16 live activations
    h = jnp.dot(h, w2_ref[...], preferred_element_type=jnp.float32) + b2_ref[...]
    h = jnp.maximum(h, 0.0).astype(cdt)
    h = jnp.dot(h, w3_ref[...], preferred_element_type=jnp.float32) + b3_ref[...]
    h = jnp.maximum(h, 0.0).astype(cdt)
    out_ref[...] = (jnp.dot(h, w4_ref[...], preferred_element_type=jnp.float32)
                    + b4_ref[...]).astype(out_ref.dtype)


# ----------------------------------------------------------------------------
# Wrapper
# ----------------------------------------------------------------------------
def mlp_forward(token_ids, prepared, output_dim, *, batch_tile=None):
    """token_ids: int32 [B, S]; prepared: lane-padded params from prepare_params."""
    emb = prepared["embedding"]                         # [vocab, Ep] f32 (HBM)
    B, S = token_ids.shape
    compute_dtype = prepared["w1"].dtype
    w_itemsize = jnp.dtype(compute_dtype).itemsize
    out_itemsize = 4

    Ep, Hp = prepared["w1"].shape
    H2p = prepared["w2"].shape[1]
    H4p = prepared["w3"].shape[1]
    Op = prepared["w4"].shape[1]

    kind = _device_kind()
    TB = batch_tile if batch_tile is not None else _default_batch_tile(kind)
    TB = max(16, min(TB, _round_up(max(B, 1), 16)))     # don't pad tiny batches
    # v7x has 2 TensorCores: make sure the "parallel" batch axis has >= 2 steps.
    if "v7" in kind and B >= 32 and _round_up(B, TB) // TB < 2:
        TB = max(16, min(TB, _round_up((B + 1) // 2, 16)))

    usable_vmem = _usable_vmem_bytes(kind)
    weight_bytes = (Ep * Hp + Hp * H2p + H2p * H4p + H4p * Op) * w_itemsize
    bias_bytes = (Hp + H2p + H4p + Op) * 4

    def stream_bytes(tb):
        return (2 * tb * Op * out_itemsize                 # double-buffered out tile
                + tb * Ep * 4                               # x_vmem scratch
                + 2 * 1 * Ep * 4                            # gather row double-buffer
                + 2 * tb * max(Hp, H2p, H4p, Op) * 4)       # f32 layer intermediates

    # Shrink TB until streaming/activation VMEM fits next to the resident weights.
    while TB > 16 and weight_bytes + bias_bytes + stream_bytes(TB) > usable_vmem:
        TB = max(16, _round_up(TB // 2, 16))

    B_pad = _round_up(max(B, 1), TB)
    grid = (B_pad // TB,)
    tok = jnp.pad(token_ids.astype(jnp.int32), ((0, B_pad - B), (0, 0)))

    needed = weight_bytes + bias_bytes + stream_bytes(TB)
    vmem_limit = min(max(2 * needed, 4 * 1024 * 1024), usable_vmem)
    vmem_limit = max(vmem_limit, needed)                 # never clamp below `needed`

    flops = 2 * B_pad * (Ep * Hp + Hp * H2p + H2p * H4p + H4p * Op)
    bytes_accessed = (B_pad * S * 4 + B_pad * S * Ep * 4          # ids + gathered rows
                      + weight_bytes + bias_bytes + B_pad * Op * out_itemsize)

    def build(weight_buffers):
        pm = pl.Buffered(weight_buffers) if weight_buffers is not None else None

        def resident(shape):   # constant index_map -> stays VMEM-resident
            if pm is None:
                return pl.BlockSpec(shape, lambda i, tok_ref: (0, 0))
            return pl.BlockSpec(shape, lambda i, tok_ref: (0, 0), pipeline_mode=pm)

        grid_spec = pltpu.PrefetchScalarGridSpec(
            num_scalar_prefetch=1,
            grid=grid,
            in_specs=[
                pl.BlockSpec(memory_space=pl.ANY),       # embedding stays in HBM
                resident((Ep, Hp)),  resident((1, Hp)),
                resident((Hp, H2p)), resident((1, H2p)),
                resident((H2p, H4p)), resident((1, H4p)),
                resident((H4p, Op)), resident((1, Op)),
            ],
            out_specs=pl.BlockSpec((TB, Op), lambda i, tok_ref: (i, 0)),
            scratch_shapes=[
                pltpu.VMEM((2, 1, Ep), jnp.float32),      # gather row double-buffer
                pltpu.SemaphoreType.DMA((2,)),
                pltpu.VMEM((TB, Ep), jnp.float32),        # mean(emb) tile
            ],
        )
        return pl.pallas_call(
            mlp_kernel,
            out_shape=jax.ShapeDtypeStruct((B_pad, Op), jnp.float32),
            grid_spec=grid_spec,
            compiler_params=pltpu.CompilerParams(
                dimension_semantics=("parallel",),
                vmem_limit_bytes=int(vmem_limit)),
            cost_estimate=pl.CostEstimate(
                flops=int(flops), transcendentals=0,
                bytes_accessed=int(bytes_accessed)),
        )

    args = (tok, emb,
            prepared["w1"], prepared["b1"],
            prepared["w2"], prepared["b2"],
            prepared["w3"], prepared["b3"],
            prepared["w4"], prepared["b4"])
    try:
        out_padded = build(1)(*args)       # single-buffered resident weights
    except Exception:
        out_padded = build(None)(*args)    # fallback: default pipeline mode

    return out_padded[:B, :output_dim]


# ----------------------------------------------------------------------------
# Parameter construction (PyTorch-equivalent init) + TPU-layout preparation
# ----------------------------------------------------------------------------
def kaiming_uniform(key, out_features, in_features):
    # torch.nn.init.kaiming_uniform_ defaults (a=0, fan_in, leaky_relu -> gain sqrt(2))
    bound = math.sqrt(6.0 / in_features)
    w = jax.random.uniform(key, (out_features, in_features),
                           minval=-bound, maxval=bound, dtype=jnp.float32)
    return w.T  # stored as [in, out] for the kernel


def linear_bias(key, out_features, in_features):
    # torch Linear default bias init: U(-1/sqrt(fan_in), 1/sqrt(fan_in))
    bound = 1.0 / math.sqrt(in_features)
    return jax.random.uniform(key, (1, out_features),
                              minval=-bound, maxval=bound, dtype=jnp.float32)


def init_params(key, vocab_size, embedding_dim, hidden_dim, output_dim):
    keys = jax.random.split(key, 9)
    h2, h4 = hidden_dim // 2, hidden_dim // 4
    # "pretrained_embeddings": deterministic synthetic embedding table
    embedding = jax.random.normal(keys[0], (vocab_size, embedding_dim),
                                  dtype=jnp.float32)
    return {
        "embedding": embedding,
        "w1": kaiming_uniform(keys[1], hidden_dim, embedding_dim),
        "b1": linear_bias(keys[2], hidden_dim, embedding_dim),
        "w2": kaiming_uniform(keys[3], h2, hidden_dim),
        "b2": linear_bias(keys[4], h2, hidden_dim),
        "w3": kaiming_uniform(keys[5], h4, h2),
        "b3": linear_bias(keys[6], h4, h2),
        "w4": kaiming_uniform(keys[7], output_dim, h4),
        "b4": linear_bias(keys[8], output_dim, h4),
    }


def prepare_params(params, *, compute_dtype=jnp.bfloat16):
    """Zero-pad every feature dim up to a multiple of 128 lanes; weights go to
    compute_dtype (bf16 storage, f32 MXU accumulation), biases stay f32."""
    def pad2(a, rows, cols):
        return jnp.pad(a, ((0, rows - a.shape[0]), (0, cols - a.shape[1])))

    E, H = params["w1"].shape
    H2 = params["w2"].shape[1]
    H4 = params["w3"].shape[1]
    O = params["w4"].shape[1]
    Ep, Hp, H2p, H4p, Op = (_round_up(d, LANE) for d in (E, H, H2, H4, O))
    vocab = params["embedding"].shape[0]

    return {
        # Lane-padded f32 embedding; stays in HBM, rows DMA'd in-kernel.
        # TODO(synk): store the table in bf16 at production vocab sizes to halve
        # the per-row DMA bytes, keeping the in-kernel mean accumulation in f32.
        "embedding": pad2(params["embedding"], vocab, Ep),
        "w1": pad2(params["w1"], Ep, Hp).astype(compute_dtype),
        "b1": pad2(params["b1"], 1, Hp),
        "w2": pad2(params["w2"], Hp, H2p).astype(compute_dtype),
        "b2": pad2(params["b2"], 1, H2p),
        "w3": pad2(params["w3"], H2p, H4p).astype(compute_dtype),
        "b3": pad2(params["b3"], 1, H4p),
        "w4": pad2(params["w4"], H4p, Op).astype(compute_dtype),
        "b4": pad2(params["b4"], 1, Op),
    }


if __name__ == "__main__":
    vocab_size, embedding_dim, hidden_dim, output_dim = 32, 16, 32, 4
    batch, seq = 2, 8

    key = jax.random.PRNGKey(0)
    k_params, k_tokens = jax.random.split(key)
    params = init_params(k_params, vocab_size, embedding_dim, hidden_dim, output_dim)
    prepared = prepare_params(params, compute_dtype=jnp.bfloat16)
    token_ids = jax.random.randint(k_tokens, (batch, seq), 0, vocab_size,
                                   dtype=jnp.int32)

    out = mlp_forward(token_ids, prepared, output_dim)
    jax.block_until_ready(out)

    # Pure-JAX reference using the same bf16-rounded matmul inputs / f32 accumulation.
    def rt(a):  # round-trip through the storage dtype used by the kernel
        return a.astype(jnp.bfloat16).astype(jnp.float32)

    x = jnp.take(params["embedding"], token_ids, axis=0).mean(axis=1)
    x = jnp.maximum(rt(x) @ rt(params["w1"]) + params["b1"], 0.0)
    x = jnp.maximum(rt(x) @ rt(params["w2"]) + params["b2"], 0.0)
    x = jnp.maximum(rt(x) @ rt(params["w3"]) + params["b3"], 0.0)
    ref = rt(x) @ rt(params["w4"]) + params["b4"]

    assert out.shape == (batch, output_dim)
    assert jnp.allclose(out, ref, atol=5e-3, rtol=5e-3), (out, ref)

    print("KERNEL_OK")
</pallas_src>

<mosaic_0001>
module attributes {stable_mosaic.version = 11 : i64} {
  func.func @mlp_kernel(%arg0: i32, %arg1: memref<16x8xi32, #tpu.memory_space<smem>>, %arg2: memref<32x128xf32, #tpu.memory_space<any>>, %arg3: memref<128x128xbf16, #tpu.memory_space<vmem>>, %arg4: memref<1x128xf32, #tpu.memory_space<vmem>>, %arg5: memref<128x128xbf16, #tpu.memory_space<vmem>>, %arg6: memref<1x128xf32, #tpu.memory_space<vmem>>, %arg7: memref<128x128xbf16, #tpu.memory_space<vmem>>, %arg8: memref<1x128xf32, #tpu.memory_space<vmem>>, %arg9: memref<128x128xbf16, #tpu.memory_space<vmem>>, %arg10: memref<1x128xf32, #tpu.memory_space<vmem>>, %arg11: memref<16x128xf32, #tpu.memory_space<vmem>>, %arg12: memref<2x1x128xf32, #tpu.memory_space<vmem>>, %arg13: memref<2x!tpu.dma_semaphore, #tpu.memory_space<semaphore_mem>>, %arg14: memref<16x128xf32, #tpu.memory_space<vmem>>) attributes {dimension_semantics = [#tpu.dimension_semantics<parallel>], iteration_bounds = array<i64: 1>, scalar_prefetch = 1 : i64, scratch_operands = 3 : i64, tpu.core_type = #tpu.core_type<tc>, window_params = [{}, {pipeline_mode = #tpu.pipeline_mode<synchronous>, transform_indices = @transform_1, window_bounds = array<i64: 128, 128>}, {pipeline_mode = #tpu.pipeline_mode<synchronous>, transform_indices = @transform_2, window_bounds = array<i64: 1, 128>}, {pipeline_mode = #tpu.pipeline_mode<synchronous>, transform_indices = @transform_3, window_bounds = array<i64: 128, 128>}, {pipeline_mode = #tpu.pipeline_mode<synchronous>, transform_indices = @transform_4, window_bounds = array<i64: 1, 128>}, {pipeline_mode = #tpu.pipeline_mode<synchronous>, transform_indices = @transform_5, window_bounds = array<i64: 128, 128>}, {pipeline_mode = #tpu.pipeline_mode<synchronous>, transform_indices = @transform_6, window_bounds = array<i64: 1, 128>}, {pipeline_mode = #tpu.pipeline_mode<synchronous>, transform_indices = @transform_7, window_bounds = array<i64: 128, 128>}, {pipeline_mode = #tpu.pipeline_mode<synchronous>, transform_indices = @transform_8, window_bounds = array<i64: 1, 128>}, {transform_indices = @transform_9, window_bounds = array<i64: 16, 128>}]} {
    %c16_i32 = arith.constant 16 : i32
    %0 = arith.muli %arg0, %c16_i32 : i32
    %c0_i32 = arith.constant 0 : i32
    %c16_i32_0 = arith.constant 16 : i32
    %1 = arith.addi %c0_i32, %c16_i32_0 : i32
    %c1_i32 = arith.constant 1 : i32
    scf.for %arg15 = %c0_i32 to %1 step %c1_i32  : i32 {
      %34 = arith.addi %0, %arg15 : i32
      %35 = arith.index_cast %34 : i32 to index
      %c0_27 = arith.constant 0 : index
      %36 = memref.load %arg1[%35, %c0_27] : memref<16x8xi32, #tpu.memory_space<smem>>
      %c0_i32_28 = arith.constant 0 : i32
      %c0_i32_29 = arith.constant 0 : i32
      %c0_i32_30 = arith.constant 0 : i32
      %37 = tpu.memref_slice %arg2[%36, %c0_i32_30] : memref<32x128xf32, #tpu.memory_space<any>> -> memref<1x128xf32, #tpu.memory_space<any>>
      %c0_i32_31 = arith.constant 0 : i32
      %c0_i32_32 = arith.constant 0 : i32
      %38 = tpu.memref_slice %arg12[%c0_i32_28, %c0_i32_31, %c0_i32_32] : memref<2x1x128xf32, #tpu.memory_space<vmem>> -> memref<1x1x128xf32, #tpu.memory_space<vmem>>
      %39 = tpu.memref_squeeze %38 : memref<1x1x128xf32, #tpu.memory_space<vmem>> -> memref<1x128xf32, #tpu.memory_space<vmem>>
      %40 = tpu.memref_slice %arg13[%c0_i32_29] : memref<2x!tpu.dma_semaphore, #tpu.memory_space<semaphore_mem>> -> memref<1x!tpu.dma_semaphore, #tpu.memory_space<semaphore_mem>>
      %41 = tpu.memref_squeeze %40 : memref<1x!tpu.dma_semaphore, #tpu.memory_space<semaphore_mem>> -> memref<!tpu.dma_semaphore, #tpu.memory_space<semaphore_mem>>
      tpu.enqueue_dma source(%37 : memref<1x128xf32, #tpu.memory_space<any>>) target(%39 : memref<1x128xf32, #tpu.memory_space<vmem>>) target_semaphore(%41 : memref<!tpu.dma_semaphore, #tpu.memory_space<semaphore_mem>>)
      %cst_33 = arith.constant 0.000000e+00 : f32
      %42 = vector.broadcast %cst_33 : f32 to vector<1x128xf32>
      %c0_i32_34 = arith.constant 0 : i32
      %c8_i32 = arith.constant 8 : i32
      %43 = arith.addi %c0_i32_34, %c8_i32 : i32
      %c1_i32_35 = arith.constant 1 : i32
      %44 = scf.for %arg16 = %c0_i32_34 to %43 step %c1_i32_35 iter_args(%arg17 = %42) -> (vector<1x128xf32>)  : i32 {
        %c1_i32_39 = arith.constant 1 : i32
        %49 = arith.andi %arg16, %c1_i32_39 : i32
        %c0_i32_40 = arith.constant 0 : i32
        %c0_i32_41 = arith.constant 0 : i32
        %50 = tpu.memref_slice %arg2[%c0_i32_40, %c0_i32_41] : memref<32x128xf32, #tpu.memory_space<any>> -> memref<1x128xf32, #tpu.memory_space<any>>
        %c0_i32_42 = arith.constant 0 : i32
        %c0_i32_43 = arith.constant 0 : i32
        %51 = tpu.memref_slice %arg12[%49, %c0_i32_42, %c0_i32_43] : memref<2x1x128xf32, #tpu.memory_space<vmem>> -> memref<1x1x128xf32, #tpu.memory_space<vmem>>
        %52 = tpu.memref_squeeze %51 : memref<1x1x128xf32, #tpu.memory_space<vmem>> -> memref<1x128xf32, #tpu.memory_space<vmem>>
        %53 = tpu.memref_slice %arg13[%49] : memref<2x!tpu.dma_semaphore, #tpu.memory_space<semaphore_mem>> -> memref<1x!tpu.dma_semaphore, #tpu.memory_space<semaphore_mem>>
        %54 = tpu.memref_squeeze %53 : memref<1x!tpu.dma_semaphore, #tpu.memory_space<semaphore_mem>> -> memref<!tpu.dma_semaphore, #tpu.memory_space<semaphore_mem>>
        tpu.wait_dma2 semaphore(%54 : memref<!tpu.dma_semaphore, #tpu.memory_space<semaphore_mem>>) src(%50 : memref<1x128xf32, #tpu.memory_space<any>>) dst(%52 : memref<1x128xf32, #tpu.memory_space<vmem>>)
        %c1_i32_44 = arith.constant 1 : i32
        %55 = arith.addi %arg16, %c1_i32_44 : i32
        %c8_i32_45 = arith.constant 8 : i32
        %56 = arith.cmpi slt, %55, %c8_i32_45 : i32
        %57 = arith.extui %56 : i1 to i32
        %c0_i32_46 = arith.constant 0 : i32
        %58 = arith.cmpi ne, %57, %c0_i32_46 : i32
        scf.if %58 {
          %c1_i32_49 = arith.constant 1 : i32
          %63 = arith.addi %arg16, %c1_i32_49 : i32
          %c1_i32_50 = arith.constant 1 : i32
          %64 = arith.subi %c1_i32_50, %49 : i32
          %65 = arith.addi %0, %arg15 : i32
          %66 = arith.index_cast %65 : i32 to index
          %67 = arith.index_cast %63 : i32 to index
          %68 = memref.load %arg1[%66, %67] : memref<16x8xi32, #tpu.memory_space<smem>>
          %c0_i32_51 = arith.constant 0 : i32
          %69 = tpu.memref_slice %arg2[%68, %c0_i32_51] : memref<32x128xf32, #tpu.memory_space<any>> -> memref<1x128xf32, #tpu.memory_space<any>>
          %c0_i32_52 = arith.constant 0 : i32
          %c0_i32_53 = arith.constant 0 : i32
          %70 = tpu.memref_slice %arg12[%64, %c0_i32_52, %c0_i32_53] : memref<2x1x128xf32, #tpu.memory_space<vmem>> -> memref<1x1x128xf32, #tpu.memory_space<vmem>>
          %71 = tpu.memref_squeeze %70 : memref<1x1x128xf32, #tpu.memory_space<vmem>> -> memref<1x128xf32, #tpu.memory_space<vmem>>
          %72 = tpu.memref_slice %arg13[%64] : memref<2x!tpu.dma_semaphore, #tpu.memory_space<semaphore_mem>> -> memref<1x!tpu.dma_semaphore, #tpu.memory_space<semaphore_mem>>
          %73 = tpu.memref_squeeze %72 : memref<1x!tpu.dma_semaphore, #tpu.memory_space<semaphore_mem>> -> memref<!tpu.dma_semaphore, #tpu.memory_space<semaphore_mem>>
          tpu.enqueue_dma source(%69 : memref<1x128xf32, #tpu.memory_space<any>>) target(%71 : memref<1x128xf32, #tpu.memory_space<vmem>>) target_semaphore(%73 : memref<!tpu.dma_semaphore, #tpu.memory_space<semaphore_mem>>)
        } else {
        }
        %59 = arith.index_cast %49 : i32 to index
        %c0_47 = arith.constant 0 : index
        %c0_48 = arith.constant 0 : index
        %60 = vector.load %arg12[%59, %c0_47, %c0_48] : memref<2x1x128xf32, #tpu.memory_space<vmem>>, vector<1x1x128xf32>
        %61 = vector.shape_cast %60 : vector<1x1x128xf32> to vector<1x128xf32>
        %62 = arith.addf %arg17, %61 : vector<1x128xf32>
        scf.yield %62 : vector<1x128xf32>
      }
      %c8_i32_36 = arith.constant 8 : i32
      %cst_37 = arith.constant 1.250000e-01 : f32
      %45 = vector.broadcast %cst_37 : f32 to vector<1x128xf32>
      %46 = arith.mulf %44, %45 : vector<1x128xf32>
      %47 = arith.index_cast %arg15 : i32 to index
      %c0_38 = arith.constant 0 : index
      %48 = vector.load %arg14[%47, %c0_38] : memref<16x128xf32, #tpu.memory_space<vmem>>, vector<1x128xf32>
      tpu.vector_store %arg14[%47, %c0_38], %46 {strides = array<i32>} : memref<16x128xf32, #tpu.memory_space<vmem>>, vector<1x128xf32>,
    }
    %c16_i32_1 = arith.constant 16 : i32
    %c0 = arith.constant 0 : index
    %c0_2 = arith.constant 0 : index
    %2 = vector.load %arg14[%c0, %c0_2] : memref<16x128xf32, #tpu.memory_space<vmem>>, vector<16x128xf32>
    %3 = arith.truncf %2 : vector<16x128xf32> to vector<16x128xbf16>
    %c0_3 = arith.constant 0 : index
    %c0_4 = arith.constant 0 : index
    %4 = vector.load %arg3[%c0_3, %c0_4] : memref<128x128xbf16, #tpu.memory_space<vmem>>, vector<128x128xbf16>
    %cst = arith.constant dense<0.000000e+00> : vector<16x128xf32>
    %5 = tpu.matmul %3, %4, %cst {dimension_numbers = #tpu.dot_dimension_numbers<[1], [0], [0], [1], [0, 0, 1, 1], [], []>} : vector<16x128xbf16>, vector<128x128xbf16>, vector<16x128xf32> -> vector<16x128xf32>
    %c0_5 = arith.constant 0 : index
    %c0_6 = arith.constant 0 : index
    %6 = vector.load %arg4[%c0_5, %c0_6] : memref<1x128xf32, #tpu.memory_space<vmem>>, vector<1x128xf32>
    %7 = vector.broadcast %6 : vector<1x128xf32> to vector<16x128xf32>
    %8 = arith.addf %5, %7 : vector<16x128xf32>
    %cst_7 = arith.constant 0.000000e+00 : f32
    %9 = vector.broadcast %cst_7 : f32 to vector<16x128xf32>
    %10 = arith.maximumf %8, %9 : vector<16x128xf32>
    %11 = arith.truncf %10 : vector<16x128xf32> to vector<16x128xbf16>
    %c0_8 = arith.constant 0 : index
    %c0_9 = arith.constant 0 : index
    %12 = vector.load %arg5[%c0_8, %c0_9] : memref<128x128xbf16, #tpu.memory_space<vmem>>, vector<128x128xbf16>
    %cst_10 = arith.constant dense<0.000000e+00> : vector<16x128xf32>
    %13 = tpu.matmul %11, %12, %cst_10 {dimension_numbers = #tpu.dot_dimension_numbers<[1], [0], [0], [1], [0, 0, 1, 1], [], []>} : vector<16x128xbf16>, vector<128x128xbf16>, vector<16x128xf32> -> vector<16x128xf32>
    %c0_11 = arith.constant 0 : index
    %c0_12 = arith.constant 0 : index
    %14 = vector.load %arg6[%c0_11, %c0_12] : memref<1x128xf32, #tpu.memory_space<vmem>>, vector<1x128xf32>
    %15 = vector.broadcast %14 : vector<1x128xf32> to vector<16x128xf32>
    %16 = arith.addf %13, %15 : vector<16x128xf32>
    %cst_13 = arith.constant 0.000000e+00 : f32
    %17 = vector.broadcast %cst_13 : f32 to vector<16x128xf32>
    %18 = arith.maximumf %16, %17 : vector<16x128xf32>
    %19 = arith.truncf %18 : vector<16x128xf32> to vector<16x128xbf16>
    %c0_14 = arith.constant 0 : index
    %c0_15 = arith.constant 0 : index
    %20 = vector.load %arg7[%c0_14, %c0_15] : memref<128x128xbf16, #tpu.memory_space<vmem>>, vector<128x128xbf16>
    %cst_16 = arith.constant dense<0.000000e+00> : vector<16x128xf32>
    %21 = tpu.matmul %19, %20, %cst_16 {dimension_numbers = #tpu.dot_dimension_numbers<[1], [0], [0], [1], [0, 0, 1, 1], [], []>} : vector<16x128xbf16>, vector<128x128xbf16>, vector<16x128xf32> -> vector<16x128xf32>
    %c0_17 = arith.constant 0 : index
    %c0_18 = arith.constant 0 : index
    %22 = vector.load %arg8[%c0_17, %c0_18] : memref<1x128xf32, #tpu.memory_space<vmem>>, vector<1x128xf32>
    %23 = vector.broadcast %22 : vector<1x128xf32> to vector<16x128xf32>
    %24 = arith.addf %21, %23 : vector<16x128xf32>
    %cst_19 = arith.constant 0.000000e+00 : f32
    %25 = vector.broadcast %cst_19 : f32 to vector<16x128xf32>
    %26 = arith.maximumf %24, %25 : vector<16x128xf32>
    %27 = arith.truncf %26 : vector<16x128xf32> to vector<16x128xbf16>
    %c0_20 = arith.constant 0 : index
    %c0_21 = arith.constant 0 : index
    %28 = vector.load %arg9[%c0_20, %c0_21] : memref<128x128xbf16, #tpu.memory_space<vmem>>, vector<128x128xbf16>
    %cst_22 = arith.constant dense<0.000000e+00> : vector<16x128xf32>
    %29 = tpu.matmul %27, %28, %cst_22 {dimension_numbers = #tpu.dot_dimension_numbers<[1], [0], [0], [1], [0, 0, 1, 1], [], []>} : vector<16x128xbf16>, vector<128x128xbf16>, vector<16x128xf32> -> vector<16x128xf32>
    %c0_23 = arith.constant 0 : index
    %c0_24 = arith.constant 0 : index
    %30 = vector.load %arg10[%c0_23, %c0_24] : memref<1x128xf32, #tpu.memory_space<vmem>>, vector<1x128xf32>
    %31 = vector.broadcast %30 : vector<1x128xf32> to vector<16x128xf32>
    %32 = arith.addf %29, %31 : vector<16x128xf32>
    %c0_25 = arith.constant 0 : index
    %c0_26 = arith.constant 0 : index
    %33 = vector.load %arg11[%c0_25, %c0_26] : memref<16x128xf32, #tpu.memory_space<vmem>>, vector<16x128xf32>
    tpu.vector_store %arg11[%c0_25, %c0_26], %32 {strides = array<i32>} : memref<16x128xf32, #tpu.memory_space<vmem>>, vector<16x128xf32>,
    return
  }
  func.func @transform_1(%arg0: i32, %arg1: memref<16x8xi32, #tpu.memory_space<smem>>) -> (i32, i32) {
    %c0_i32 = arith.constant 0 : i32
    %c0_i32_0 = arith.constant 0 : i32
    %c0_i32_1 = arith.constant 0 : i32
    return %c0_i32, %c0_i32_0 : i32, i32
  }
  func.func @transform_2(%arg0: i32, %arg1: memref<16x8xi32, #tpu.memory_space<smem>>) -> (i32, i32) {
    %c0_i32 = arith.constant 0 : i32
    %c0_i32_0 = arith.constant 0 : i32
    %c0_i32_1 = arith.constant 0 : i32
    return %c0_i32, %c0_i32_0 : i32, i32
  }
  func.func @transform_3(%arg0: i32, %arg1: memref<16x8xi32, #tpu.memory_space<smem>>) -> (i32, i32) {
    %c0_i32 = arith.constant 0 : i32
    %c0_i32_0 = arith.constant 0 : i32
    %c0_i32_1 = arith.constant 0 : i32
    return %c0_i32, %c0_i32_0 : i32, i32
  }
  func.func @transform_4(%arg0: i32, %arg1: memref<16x8xi32, #tpu.memory_space<smem>>) -> (i32, i32) {
    %c0_i32 = arith.constant 0 : i32
    %c0_i32_0 = arith.constant 0 : i32
    %c0_i32_1 = arith.constant 0 : i32
    return %c0_i32, %c0_i32_0 : i32, i32
  }
  func.func @transform_5(%arg0: i32, %arg1: memref<16x8xi32, #tpu.memory_space<smem>>) -> (i32, i32) {
    %c0_i32 = arith.constant 0 : i32
    %c0_i32_0 = arith.constant 0 : i32
    %c0_i32_1 = arith.constant 0 : i32
    return %c0_i32, %c0_i32_0 : i32, i32
  }
  func.func @transform_6(%arg0: i32, %arg1: memref<16x8xi32, #tpu.memory_space<smem>>) -> (i32, i32) {
    %c0_i32 = arith.constant 0 : i32
    %c0_i32_0 = arith.constant 0 : i32
    %c0_i32_1 = arith.constant 0 : i32
    return %c0_i32, %c0_i32_0 : i32, i32
  }
  func.func @transform_7(%arg0: i32, %arg1: memref<16x8xi32, #tpu.memory_space<smem>>) -> (i32, i32) {
    %c0_i32 = arith.constant 0 : i32
    %c0_i32_0 = arith.constant 0 : i32
    %c0_i32_1 = arith.constant 0 : i32
    return %c0_i32, %c0_i32_0 : i32, i32
  }
  func.func @transform_8(%arg0: i32, %arg1: memref<16x8xi32, #tpu.memory_space<smem>>) -> (i32, i32) {
    %c0_i32 = arith.constant 0 : i32
    %c0_i32_0 = arith.constant 0 : i32
    %c0_i32_1 = arith.constant 0 : i32
    return %c0_i32, %c0_i32_0 : i32, i32
  }
  func.func @transform_9(%arg0: i32, %arg1: memref<16x8xi32, #tpu.memory_space<smem>>) -> (i32, i32) {
    %c0_i32 = arith.constant 0 : i32
    %c0_i32_0 = arith.constant 0 : i32
    return %arg0, %c0_i32 : i32, i32
  }
}

module attributes {stable_mosaic.version = 11 : i64} {
  func.func @mlp_kernel(%arg0: i32, %arg1: memref<16x8xi32, #tpu.memory_space<smem>>, %arg2: memref<32x128xf32, #tpu.memory_space<any>>, %arg3: memref<128x128xbf16, #tpu.memory_space<vmem>>, %arg4: memref<1x128xf32, #tpu.memory_space<vmem>>, %arg5: memref<128x128xbf16, #tpu.memory_space<vmem>>, %arg6: memref<1x128xf32, #tpu.memory_space<vmem>>, %arg7: memref<128x128xbf16, #tpu.memory_space<vmem>>, %arg8: memref<1x128xf32, #tpu.memory_space<vmem>>, %arg9: memref<128x128xbf16, #tpu.memory_space<vmem>>, %arg10: memref<1x128xf32, #tpu.memory_space<vmem>>, %arg11: memref<16x128xf32, #tpu.memory_space<vmem>>, %arg12: memref<2x1x128xf32, #tpu.memory_space<vmem>>, %arg13: memref<2x!tpu.dma_semaphore, #tpu.memory_space<semaphore_mem>>, %arg14: memref<16x128xf32, #tpu.memory_space<vmem>>) attributes {dimension_semantics = [#tpu.dimension_semantics<parallel>], iteration_bounds = array<i64: 1>, scalar_prefetch = 1 : i64, scratch_operands = 3 : i64, tpu.core_type = #tpu.core_type<tc>, window_params = [{}, {pipeline_mode = #tpu.pipeline_mode<synchronous>, transform_indices = @transform_1, window_bounds = array<i64: 128, 128>}, {pipeline_mode = #tpu.pipeline_mode<synchronous>, transform_indices = @transform_2, window_bounds = array<i64: 1, 128>}, {pipeline_mode = #tpu.pipeline_mode<synchronous>, transform_indices = @transform_3, window_bounds = array<i64: 128, 128>}, {pipeline_mode = #tpu.pipeline_mode<synchronous>, transform_indices = @transform_4, window_bounds = array<i64: 1, 128>}, {pipeline_mode = #tpu.pipeline_mode<synchronous>, transform_indices = @transform_5, window_bounds = array<i64: 128, 128>}, {pipeline_mode = #tpu.pipeline_mode<synchronous>, transform_indices = @transform_6, window_bounds = array<i64: 1, 128>}, {pipeline_mode = #tpu.pipeline_mode<synchronous>, transform_indices = @transform_7, window_bounds = array<i64: 128, 128>}, {pipeline_mode = #tpu.pipeline_mode<synchronous>, transform_indices = @transform_8, window_bounds = array<i64: 1, 128>}, {transform_indices = @transform_9, window_bounds = array<i64: 16, 128>}]} {
    %c16_i32 = arith.constant 16 : i32
    %0 = arith.muli %arg0, %c16_i32 : i32
    %c0_i32 = arith.constant 0 : i32
    %c16_i32_0 = arith.constant 16 : i32
    %1 = arith.addi %c0_i32, %c16_i32_0 : i32
    %c1_i32 = arith.constant 1 : i32
    scf.for %arg15 = %c0_i32 to %1 step %c1_i32  : i32 {
      %34 = arith.addi %0, %arg15 : i32
      %35 = arith.index_cast %34 : i32 to index
      %c0_27 = arith.constant 0 : index
      %36 = memref.load %arg1[%35, %c0_27] : memref<16x8xi32, #tpu.memory_space<smem>>
      %c0_i32_28 = arith.constant 0 : i32
      %c0_i32_29 = arith.constant 0 : i32
      %c0_i32_30 = arith.constant 0 : i32
      %37 = tpu.memref_slice %arg2[%36, %c0_i32_30] : memref<32x128xf32, #tpu.memory_space<any>> -> memref<1x128xf32, #tpu.memory_space<any>>
      %c0_i32_31 = arith.constant 0 : i32
      %c0_i32_32 = arith.constant 0 : i32
      %38 = tpu.memref_slice %arg12[%c0_i32_28, %c0_i32_31, %c0_i32_32] : memref<2x1x128xf32, #tpu.memory_space<vmem>> -> memref<1x1x128xf32, #tpu.memory_space<vmem>>
      %39 = tpu.memref_squeeze %38 : memref<1x1x128xf32, #tpu.memory_space<vmem>> -> memref<1x128xf32, #tpu.memory_space<vmem>>
      %40 = tpu.memref_slice %arg13[%c0_i32_29] : memref<2x!tpu.dma_semaphore, #tpu.memory_space<semaphore_mem>> -> memref<1x!tpu.dma_semaphore, #tpu.memory_space<semaphore_mem>>
      %41 = tpu.memref_squeeze %40 : memref<1x!tpu.dma_semaphore, #tpu.memory_space<semaphore_mem>> -> memref<!tpu.dma_semaphore, #tpu.memory_space<semaphore_mem>>
      tpu.enqueue_dma source(%37 : memref<1x128xf32, #tpu.memory_space<any>>) target(%39 : memref<1x128xf32, #tpu.memory_space<vmem>>) target_semaphore(%41 : memref<!tpu.dma_semaphore, #tpu.memory_space<semaphore_mem>>)
      %cst_33 = arith.constant 0.000000e+00 : f32
      %42 = vector.broadcast %cst_33 : f32 to vector<1x128xf32>
      %c0_i32_34 = arith.constant 0 : i32
      %c8_i32 = arith.constant 8 : i32
      %43 = arith.addi %c0_i32_34, %c8_i32 : i32
      %c1_i32_35 = arith.constant 1 : i32
      %44 = scf.for %arg16 = %c0_i32_34 to %43 step %c1_i32_35 iter_args(%arg17 = %42) -> (vector<1x128xf32>)  : i32 {
        %c1_i32_39 = arith.constant 1 : i32
        %49 = arith.andi %arg16, %c1_i32_39 : i32
        %c0_i32_40 = arith.constant 0 : i32
        %c0_i32_41 = arith.constant 0 : i32
        %50 = tpu.memref_slice %arg2[%c0_i32_40, %c0_i32_41] : memref<32x128xf32, #tpu.memory_space<any>> -> memref<1x128xf32, #tpu.memory_space<any>>
        %c0_i32_42 = arith.constant 0 : i32
        %c0_i32_43 = arith.constant 0 : i32
        %51 = tpu.memref_slice %arg12[%49, %c0_i32_42, %c0_i32_43] : memref<2x1x128xf32, #tpu.memory_space<vmem>> -> memref<1x1x128xf32, #tpu.memory_space<vmem>>
        %52 = tpu.memref_squeeze %51 : memref<1x1x128xf32, #tpu.memory_space<vmem>> -> memref<1x128xf32, #tpu.memory_space<vmem>>
        %53 = tpu.memref_slice %arg13[%49] : memref<2x!tpu.dma_semaphore, #tpu.memory_space<semaphore_mem>> -> memref<1x!tpu.dma_semaphore, #tpu.memory_space<semaphore_mem>>
        %54 = tpu.memref_squeeze %53 : memref<1x!tpu.dma_semaphore, #tpu.memory_space<semaphore_mem>> -> memref<!tpu.dma_semaphore, #tpu.memory_space<semaphore_mem>>
        tpu.wait_dma2 semaphore(%54 : memref<!tpu.dma_semaphore, #tpu.memory_space<semaphore_mem>>) src(%50 : memref<1x128xf32, #tpu.memory_space<any>>) dst(%52 : memref<1x128xf32, #tpu.memory_space<vmem>>)
        %c1_i32_44 = arith.constant 1 : i32
        %55 = arith.addi %arg16, %c1_i32_44 : i32
        %c8_i32_45 = arith.constant 8 : i32
        %56 = arith.cmpi slt, %55, %c8_i32_45 : i32
        %57 = arith.extui %56 : i1 to i32
        %c0_i32_46 = arith.constant 0 : i32
        %58 = arith.cmpi ne, %57, %c0_i32_46 : i32
        scf.if %58 {
          %c1_i32_49 = arith.constant 1 : i32
          %63 = arith.addi %arg16, %c1_i32_49 : i32
          %c1_i32_50 = arith.constant 1 : i32
          %64 = arith.subi %c1_i32_50, %49 : i32
          %65 = arith.addi %0, %arg15 : i32
          %66 = arith.index_cast %65 : i32 to index
          %67 = arith.index_cast %63 : i32 to index
          %68 = memref.load %arg1[%66, %67] : memref<16x8xi32, #tpu.memory_space<smem>>
          %c0_i32_51 = arith.constant 0 : i32
          %69 = tpu.memref_slice %arg2[%68, %c0_i32_51] : memref<32x128xf32, #tpu.memory_space<any>> -> memref<1x128xf32, #tpu.memory_space<any>>
          %c0_i32_52 = arith.constant 0 : i32
          %c0_i32_53 = arith.constant 0 : i32
          %70 = tpu.memref_slice %arg12[%64, %c0_i32_52, %c0_i32_53] : memref<2x1x128xf32, #tpu.memory_space<vmem>> -> memref<1x1x128xf32, #tpu.memory_space<vmem>>
          %71 = tpu.memref_squeeze %70 : memref<1x1x128xf32, #tpu.memory_space<vmem>> -> memref<1x128xf32, #tpu.memory_space<vmem>>
          %72 = tpu.memref_slice %arg13[%64] : memref<2x!tpu.dma_semaphore, #tpu.memory_space<semaphore_mem>> -> memref<1x!tpu.dma_semaphore, #tpu.memory_space<semaphore_mem>>
          %73 = tpu.memref_squeeze %72 : memref<1x!tpu.dma_semaphore, #tpu.memory_space<semaphore_mem>> -> memref<!tpu.dma_semaphore, #tpu.memory_space<semaphore_mem>>
          tpu.enqueue_dma source(%69 : memref<1x128xf32, #tpu.memory_space<any>>) target(%71 : memref<1x128xf32, #tpu.memory_space<vmem>>) target_semaphore(%73 : memref<!tpu.dma_semaphore, #tpu.memory_space<semaphore_mem>>)
        } else {
        }
        %59 = arith.index_cast %49 : i32 to index
        %c0_47 = arith.constant 0 : index
        %c0_48 = arith.constant 0 : index
        %60 = vector.load %arg12[%59, %c0_47, %c0_48] : memref<2x1x128xf32, #tpu.memory_space<vmem>>, vector<1x1x128xf32>
        %61 = vector.shape_cast %60 : vector<1x1x128xf32> to vector<1x128xf32>
        %62 = arith.addf %arg17, %61 : vector<1x128xf32>
        scf.yield %62 : vector<1x128xf32>
      }
      %c8_i32_36 = arith.constant 8 : i32
      %cst_37 = arith.constant 1.250000e-01 : f32
      %45 = vector.broadcast %cst_37 : f32 to vector<1x128xf32>
      %46 = arith.mulf %44, %45 : vector<1x128xf32>
      %47 = arith.index_cast %arg15 : i32 to index
      %c0_38 = arith.constant 0 : index
      %48 = vector.load %arg14[%47, %c0_38] : memref<16x128xf32, #tpu.memory_space<vmem>>, vector<1x128xf32>
      tpu.vector_store %arg14[%47, %c0_38], %46 {strides = array<i32>} : memref<16x128xf32, #tpu.memory_space<vmem>>, vector<1x128xf32>,
    }
    %c16_i32_1 = arith.constant 16 : i32
    %c0 = arith.constant 0 : index
    %c0_2 = arith.constant 0 : index
    %2 = vector.load %arg14[%c0, %c0_2] : memref<16x128xf32, #tpu.memory_space<vmem>>, vector<16x128xf32>
    %3 = arith.truncf %2 : vector<16x128xf32> to vector<16x128xbf16>
    %c0_3 = arith.constant 0 : index
    %c0_4 = arith.constant 0 : index
    %4 = vector.load %arg3[%c0_3, %c0_4] : memref<128x128xbf16, #tpu.memory_space<vmem>>, vector<128x128xbf16>
    %cst = arith.constant dense<0.000000e+00> : vector<16x128xf32>
    %5 = tpu.matmul %3, %4, %cst {dimension_numbers = #tpu.dot_dimension_numbers<[1], [0], [0], [1], [0, 0, 1, 1], [], []>} : vector<16x128xbf16>, vector<128x128xbf16>, vector<16x128xf32> -> vector<16x128xf32>
    %c0_5 = arith.constant 0 : index
    %c0_6 = arith.constant 0 : index
    %6 = vector.load %arg4[%c0_5, %c0_6] : memref<1x128xf32, #tpu.memory_space<vmem>>, vector<1x128xf32>
    %7 = vector.broadcast %6 : vector<1x128xf32> to vector<16x128xf32>
    %8 = arith.addf %5, %7 : vector<16x128xf32>
    %cst_7 = arith.constant 0.000000e+00 : f32
    %9 = vector.broadcast %cst_7 : f32 to vector<16x128xf32>
    %10 = arith.maximumf %8, %9 : vector<16x128xf32>
    %11 = arith.truncf %10 : vector<16x128xf32> to vector<16x128xbf16>
    %c0_8 = arith.constant 0 : index
    %c0_9 = arith.constant 0 : index
    %12 = vector.load %arg5[%c0_8, %c0_9] : memref<128x128xbf16, #tpu.memory_space<vmem>>, vector<128x128xbf16>
    %cst_10 = arith.constant dense<0.000000e+00> : vector<16x128xf32>
    %13 = tpu.matmul %11, %12, %cst_10 {dimension_numbers = #tpu.dot_dimension_numbers<[1], [0], [0], [1], [0, 0, 1, 1], [], []>} : vector<16x128xbf16>, vector<128x128xbf16>, vector<16x128xf32> -> vector<16x128xf32>
    %c0_11 = arith.constant 0 : index
    %c0_12 = arith.constant 0 : index
    %14 = vector.load %arg6[%c0_11, %c0_12] : memref<1x128xf32, #tpu.memory_space<vmem>>, vector<1x128xf32>
    %15 = vector.broadcast %14 : vector<1x128xf32> to vector<16x128xf32>
    %16 = arith.addf %13, %15 : vector<16x128xf32>
    %cst_13 = arith.constant 0.000000e+00 : f32
    %17 = vector.broadcast %cst_13 : f32 to vector<16x128xf32>
    %18 = arith.maximumf %16, %17 : vector<16x128xf32>
    %19 = arith.truncf %18 : vector<16x128xf32> to vector<16x128xbf16>
    %c0_14 = arith.constant 0 : index
    %c0_15 = arith.constant 0 : index
    %20 = vector.load %arg7[%c0_14, %c0_15] : memref<128x128xbf16, #tpu.memory_space<vmem>>, vector<128x128xbf16>
    %cst_16 = arith.constant dense<0.000000e+00> : vector<16x128xf32>
    %21 = tpu.matmul %19, %20, %cst_16 {dimension_numbers = #tpu.dot_dimension_numbers<[1], [0], [0], [1], [0, 0, 1, 1], [], []>} : vector<16x128xbf16>, vector<128x128xbf16>, vector<16x128xf32> -> vector<16x128xf32>
    %c0_17 = arith.constant 0 : index
    %c0_18 = arith.constant 0 : index
    %22 = vector.load %arg8[%c0_17, %c0_18] : memref<1x128xf32, #tpu.memory_space<vmem>>, vector<1x128xf32>
    %23 = vector.broadcast %22 : vector<1x128xf32> to vector<16x128xf32>
    %24 = arith.addf %21, %23 : vector<16x128xf32>
    %cst_19 = arith.constant 0.000000e+00 : f32
    %25 = vector.broadcast %cst_19 : f32 to vector<16x128xf32>
    %26 = arith.maximumf %24, %25 : vector<16x128xf32>
    %27 = arith.truncf %26 : vector<16x128xf32> to vector<16x128xbf16>
    %c0_20 = arith.constant 0 : index
    %c0_21 = arith.constant 0 : index
    %28 = vector.load %arg9[%c0_20, %c0_21] : memref<128x128xbf16, #tpu.memory_space<vmem>>, vector<128x128xbf16>
    %cst_22 = arith.constant dense<0.000000e+00> : vector<16x128xf32>
    %29 = tpu.matmul %27, %28, %cst_22 {dimension_numbers = #tpu.dot_dimension_numbers<[1], [0], [0], [1], [0, 0, 1, 1], [], []>} : vector<16x128xbf16>, vector<128x128xbf16>, vector<16x128xf32> -> vector<16x128xf32>
    %c0_23 = arith.constant 0 : index
    %c0_24 = arith.constant 0 : index
    %30 = vector.load %arg10[%c0_23, %c0_24] : memref<1x128xf32, #tpu.memory_space<vmem>>, vector<1x128xf32>
    %31 = vector.broadcast %30 : vector<1x128xf32> to vector<16x128xf32>
    %32 = arith.addf %29, %31 : vector<16x128xf32>
    %c0_25 = arith.constant 0 : index
    %c0_26 = arith.constant 0 : index
    %33 = vector.load %arg11[%c0_25, %c0_26] : memref<16x128xf32, #tpu.memory_space<vmem>>, vector<16x128xf32>
    tpu.vector_store %arg11[%c0_25, %c0_26], %32 {strides = array<i32>} : memref<16x128xf32, #tpu.memory_space<vmem>>, vector<16x128xf32>,
    return
  }
  func.func @transform_1(%arg0: i32, %arg1: memref<16x8xi32, #tpu.memory_space<smem>>) -> (i32, i32) {
    %c0_i32 = arith.constant 0 : i32
    %c0_i32_0 = arith.constant 0 : i32
    %c0_i32_1 = arith.constant 0 : i32
    return %c0_i32, %c0_i32_0 : i32, i32
  }
  func.func @transform_2(%arg0: i32, %arg1: memref<16x8xi32, #tpu.memory_space<smem>>) -> (i32, i32) {
    %c0_i32 = arith.constant 0 : i32
    %c0_i32_0 = arith.constant 0 : i32
    %c0_i32_1 = arith.constant 0 : i32
    return %c0_i32, %c0_i32_0 : i32, i32
  }
  func.func @transform_3(%arg0: i32, %arg1: memref<16x8xi32, #tpu.memory_space<smem>>) -> (i32, i32) {
    %c0_i32 = arith.constant 0 : i32
    %c0_i32_0 = arith.constant 0 : i32
    %c0_i32_1 = arith.constant 0 : i32
    return %c0_i32, %c0_i32_0 : i32, i32
  }
  func.func @transform_4(%arg0: i32, %arg1: memref<16x8xi32, #tpu.memory_space<smem>>) -> (i32, i32) {
    %c0_i32 = arith.constant 0 : i32
    %c0_i32_0 = arith.constant 0 : i32
    %c0_i32_1 = arith.constant 0 : i32
    return %c0_i32, %c0_i32_0 : i32, i32
  }
  func.func @transform_5(%arg0: i32, %arg1: memref<16x8xi32, #tpu.memory_space<smem>>) -> (i32, i32) {
    %c0_i32 = arith.constant 0 : i32
    %c0_i32_0 = arith.constant 0 : i32
    %c0_i32_1 = arith.constant 0 : i32
    return %c0_i32, %c0_i32_0 : i32, i32
  }
  func.func @transform_6(%arg0: i32, %arg1: memref<16x8xi32, #tpu.memory_space<smem>>) -> (i32, i32) {
    %c0_i32 = arith.constant 0 : i32
    %c0_i32_0 = arith.constant 0 : i32
    %c0_i32_1 = arith.constant 0 : i32
    return %c0_i32, %c0_i32_0 : i32, i32
  }
  func.func @transform_7(%arg0: i32, %arg1: memref<16x8xi32, #tpu.memory_space<smem>>) -> (i32, i32) {
    %c0_i32 = arith.constant 0 : i32
    %c0_i32_0 = arith.constant 0 : i32
    %c0_i32_1 = arith.constant 0 : i32
    return %c0_i32, %c0_i32_0 : i32, i32
  }
  func.func @transform_8(%arg0: i32, %arg1: memref<16x8xi32, #tpu.memory_space<smem>>) -> (i32, i32) {
    %c0_i32 = arith.constant 0 : i32
    %c0_i32_0 = arith.constant 0 : i32
    %c0_i32_1 = arith.constant 0 : i32
    return %c0_i32, %c0_i32_0 : i32, i32
  }
  func.func @transform_9(%arg0: i32, %arg1: memref<16x8xi32, #tpu.memory_space<smem>>) -> (i32, i32) {
    %c0_i32 = arith.constant 0 : i32
    %c0_i32_0 = arith.constant 0 : i32
    return %arg0, %c0_i32 : i32, i32
  }
}

</mosaic_0001>

<bundles_post_ra>
// kernel: tpu_custom_call.1
= control target key start
LH: loop header
LB: loop body
LE: loop exit
PB: predicated region body
PF: predicated region fallthrough
CT: control target
= control target key end

     0   :  { %s1410_s0 = inlined_call_operand.vmem [shape: s32[16,8], index: 0, kind: input, shape index: {}]   ;;  %s1411_s1 = inlined_call_operand.hbm [shape: f32[32,128], index: 1, kind: input, shape index: {}]   ;;  %s1412_s2 = inlined_call_operand.hbm [shape: bf16[128,128], index: 2, kind: input, shape index: {}]   ;;  %s1413_s3 = inlined_call_operand.vmem [shape: f32[1,128], index: 3, kind: input, shape index: {}]   ;;  %s1414_s4 = inlined_call_operand.hbm [shape: bf16[128,128], index: 4, kind: input, shape index: {}]   ;;  %s1415_s5 = inlined_call_operand.vmem [shape: f32[1,128], index: 5, kind: input, shape index: {}]   ;;  %s1416_s6 = inlined_call_operand.hbm [shape: bf16[128,128], index: 6, kind: input, shape index: {}]   ;;  %s1417_s7 = inlined_call_operand.vmem [shape: f32[1,128], index: 7, kind: input, shape index: {}]   ;;  %s1418_s8 = inlined_call_operand.hbm [shape: bf16[128,128], index: 8, kind: input, shape index: {}]   ;;  %s1419_s9 = inlined_call_operand.vmem [shape: f32[1,128], index: 9, kind: input, shape index: {}]   ;;  %s1420_s10 = inlined_call_operand.hbm [shape: f32[16,128], index: 10, kind: output, shape index: {}]  }
   0x1   :  { %s15_s15 = sshll.u32 %s1410_s0, 4  ;;  %s16_s15 = int_to_ptr.vmem [resolvable:$true] %s15_s15 }
   0x2   :  { %s913_s16 = scalar_lea.vmem %s16_s15, 256  ;;  %p918_p1 = scmp.lt.s32.totalorder %s16_s15, %s16_s15 }
   0x3   :  { %p914_p0 = scmp.ne.s32.totalorder %s16_s15, %s913_s16  ;;  %p919_p2 = scmp.lt.s32.totalorder %s913_s16, %s913_s16 }
   0x5   :  { %p920_p3 = por %p919_p2, %p918_p1 }
   0x7   :  { %p921_p4 = pnand %p920_p3, %p914_p0 }
   0x9   :  { %924 = shalt.err (!%p921_p4)  }
   0xa   :  { %s1123_s17 = smov [#allocation6]  }
   0xb   :  { %18 = dma.vmem_to_smem %s16_s15, 256, %s1123_s17, [#allocation5] }
   0xc   :  { %1099 = dma.done.wait [#allocation5], 256 }
   0xd   :  { %1100 = vsyncadd [#allocation5], 4294967040 }
   0xe   :  { %20 = sfence }
   0xf   :  { %21 = vsyncpa [#allocation8], 0 }
  0x10   :  { %22 = vsyncpa [#allocation11], 0 }
  0x11   :  { %23 = vsyncpa [#allocation14], 0 }
  0x12   :  { %24 = vsyncpa [#allocation9], 0  ;;  %s1124_s18 = smov [#allocation10]   ;;  %s1125_s0 = smov [#allocation7]  }
  0x13   :  { %s44_s19 = sshll.u32 %s1124_s18, 4  ;;  %s30_s20 = sshll.u32 %s1125_s0, 4  ;;  %s45_s19 = int_to_ptr.vmem [resolvable:$true] %s44_s19  ;;  %s1194_s20 = int_to_ptr.vmem [resolvable:$true] %s30_s20 }
  0x14   :  { %s925_s23 = scalar_lea.hbm %s1414_s4, 1024 }
  0x15   :  { %p926_p5 = scmp.ne.s32.totalorder %s1414_s4, %s925_s23  ;;  %p929_p6 = scmp.lt.u32.totalorder %s925_s23, %s1414_s4 }
  0x17   :  { %p931_p7 = pnand %p929_p6, %p926_p5 }
  0x19   :  { %934 = shalt.err (!%p931_p7)
}
  0x1a   :  { %s935_s28 = scalar_lea.vmem %s45_s19, 1024  ;;  %p940_p9 = scmp.lt.s32.totalorder %s45_s19, %s45_s19 }
  0x1b   :  { %p936_p8 = scmp.ne.s32.totalorder %s45_s19, %s935_s28  ;;  %p941_p10 = scmp.lt.s32.totalorder %s935_s28, %s935_s28 }
  0x1d   :  { %p942_p11 = por %p941_p10, %p940_p9 }
  0x1f   :  { %p943_p12 = pnand %p942_p11, %p936_p8 }
  0x21   :  { %946 = shalt.err (!%p943_p12)
}
  0x22   :  { %s1126_s29 = smov 64   ;;  %s1127_s30 = smov 4  }
  0x23   :  { %50 = dma.hbm_to_vmem [thread:$0]  %s1414_s4, 1024, %s45_s19, [#allocation11], %s1126_s29, %s1126_s29, %s1127_s30  }
  0x24   :  { %s947_s15 = scalar_lea.hbm %s1412_s2, 1024 }
  0x25   :  { %p948_p13 = scmp.ne.s32.totalorder %s1412_s2, %s947_s15  ;;  %p951_p0 = scmp.lt.u32.totalorder %s947_s15, %s1412_s2 }
  0x27   :  { %p953_p1 = pnand %p951_p0, %p948_p13 }
  0x29   :  { %956 = shalt.err (!%p953_p1)
}
  0x2a   :  { %s957_s21 = scalar_lea.vmem %s1194_s20, 1024  ;;  %p962_p3 = scmp.lt.s32.totalorder %s1194_s20, %s1194_s20 }
  0x2b   :  { %p958_p2 = scmp.ne.s32.totalorder %s1194_s20, %s957_s21  ;;  %p963_p4 = scmp.lt.s32.totalorder %s957_s21, %s957_s21 }
  0x2d   :  { %p964_p5 = por %p963_p4, %p962_p3 }
  0x2f   :  { %p965_p6 = pnand %p964_p5, %p958_p2 }
  0x31   :  { %968 = shalt.err (!%p965_p6)
}
  0x32   :  { %36 = dma.hbm_to_vmem [thread:$0]  %s1412_s2, 1024, %s1194_s20, [#allocation8], %s1126_s29, %s1126_s29, %s1127_s30  }
  0x33   :  { %s1128_s22 = smov [#allocation12]   ;;  %s1129_s24 = smov [#allocation13]  }
  0x34   :  { %s58_s23 = sshll.u32 %s1128_s22, 4  ;;  %s72_s25 = sshll.u32 %s1129_s24, 4  ;;  %s59_s23 = int_to_ptr.vmem [resolvable:$true] %s58_s23  ;;  %s1231_s25 = int_to_ptr.vmem [resolvable:$true] %s72_s25 }
  0x35   :  { %s969_s28 = scalar_lea.hbm %s1416_s6, 1024 }
  0x36   :  { %p970_p7 = scmp.ne.s32.totalorder %s1416_s6, %s969_s28  ;;  %p973_p8 = scmp.lt.u32.totalorder %s969_s28, %s1416_s6 }
  0x38   :  { %p975_p9 = pnand %p973_p8, %p970_p7 }
  0x3a   :  { %978 = shalt.err (!%p975_p9)
}
  0x3b   :  { %s979_s2 = scalar_lea.vmem %s59_s23, 1024  ;;  %p984_p11 = scmp.lt.s32.totalorder %s59_s23, %s59_s23 }
  0x3c   :  { %p980_p10 = scmp.ne.s32.totalorder %s59_s23, %s979_s2  ;;  %p985_p12 = scmp.lt.s32.totalorder %s979_s2, %s979_s2 }
  0x3e   :  { %p986_p13 = por %p985_p12, %p984_p11 }
  0x40   :  { %p987_p0 = pnand %p986_p13, %p980_p10 }
  0x42   :  { %990 = shalt.err (!%p987_p0)
}
  0x43   :  { %64 = dma.hbm_to_vmem [thread:$0]  %s1416_s6, 1024, %s59_s23, [#allocation11], %s1126_s29, %s1126_s29, %s1127_s30  }
  0x44   :  { %s991_s18 = scalar_lea.hbm %s1418_s8, 1024 }
  0x45   :  { %p992_p1 = scmp.ne.s32.totalorder %s1418_s8, %s991_s18  ;;  %p995_p2 = scmp.lt.u32.totalorder %s991_s18, %s1418_s8 }
  0x47   :  { %p997_p3 = pnand %p995_p2, %p992_p1 }
  0x49   :  { %1000 = shalt.err (!%p997_p3)
}
  0x4a   :  { %s1001_s22 = scalar_lea.vmem %s1231_s25, 1024  ;;  %p1006_p5 = scmp.lt.s32.totalorder %s1231_s25, %s1231_s25 }
  0x4b   :  { %p1002_p4 = scmp.ne.s32.totalorder %s1231_s25, %s1001_s22  ;;  %p1007_p6 = scmp.lt.s32.totalorder %s1001_s22, %s1001_s22 }
  0x4d   :  { %p1008_p7 = por %p1007_p6, %p1006_p5 }
  0x4f   :  { %p1009_p8 = pnand %p1008_p7, %p1002_p4 }
  0x51   :  { %1012 = shalt.err (!%p1009_p8)
}
  0x52   :  { %78 = dma.hbm_to_vmem [thread:$0]  %s1418_s8, 1024, %s1231_s25, [#allocation14], %s1126_s29, %s1126_s29, %s1127_s30  }
  0x53   :  { %1101 = dma.done.wait [#allocation8], 1024  }
  0x54   :  { %1102 = vsyncadd [#allocation8], 4294966272 }
  0x55   :  { %1103 = dma.done.wait [#allocation11], 2048  }
  0x56   :  { %1104 = vsyncadd [#allocation11], 4294965248 }
  0x57   :  { %1105 = dma.done.wait [#allocation14], 1024  }
  0x58   :  { %1106 = vsyncadd [#allocation14], 4294966272  ;;  %s1268_s24 = smov 0  }
  0x59 LB: > { %s680_s26 = sshll.u32 %s1113_s24, 7  ;;  %s1130_s28 = smov [#allocation2]   ;;  %s1113_s24 = sphi %s1268_s24, %s100_s24  }
  0x5a   : > { %s103_s27 = sld [smem:[#allocation6 + %s680_s26]]  ;;  %s113_s11 = sshll.u32 %s1130_s28, 4  ;;  %s1274_s11 = int_to_ptr.vmem [resolvable:$true] %s113_s11 }
  0x5b   : > { %s1015_s2 = scalar_lea.hbm %s1411_s1, 512 }
  0x60   : > { %s681_s8 = sshll.u32 %s103_s27, 4 }
  0x61   : > { %s105_s25 = scalar_lea.hbm %s1411_s1, %s681_s8 }
  0x62   : > { %s1013_s12 = scalar_lea.hbm %s105_s25, 16  ;;  %p1016_p10 = scmp.lt.u32.totalorder %s105_s25, %s1411_s1 }
  0x63   : > { %p1014_p9 = scmp.ne.s32.totalorder %s105_s25, %s1013_s12  ;;  %p1017_p11 = scmp.lt.u32.totalorder %s1015_s2, %s1013_s12 }
  0x64   : > { %p1019_p13 = scmp.lt.u32.totalorder %s1013_s12, %s105_s25 }
  0x65   : > { %p1018_p12 = por %p1017_p11, %p1016_p10 }
  0x67   : > { %p1020_p0 = por %p1019_p13, %p1018_p12 }
  0x69   : > { %p1021_p1 = pnand %p1020_p0, %p1014_p9 }
  0x6b   : > { %1024 = shalt.err (!%p1021_p1)  }
  0x6c   : > { %s1025_s18 = scalar_lea.vmem %s1274_s11, 16  ;;  %s1029_s0 = scalar_lea.vmem %s1274_s11, 32 }
  0x6d   : > { %p1026_p2 = scmp.ne.s32.totalorder %s1274_s11, %s1025_s18  ;;  %p1030_p3 = scmp.lt.s32.totalorder %s1274_s11, %s1274_s11 }
  0x6e   : > { %p1031_p4 = scmp.lt.s32.totalorder %s1029_s0, %s1025_s18 }
  0x70   : > { %p1032_p5 = por %p1031_p4, %p1030_p3 }
  0x72   : > { %p1033_p6 = pnand %p1032_p5, %p1026_p2 }
  0x74   : > { %1036 = shalt.err (!%p1033_p6)  }
  0x75   : > { %116 = dma.hbm_to_vmem [thread:$0]  %s105_s25, 16, %s1274_s11, [#allocation3]  ;;  %v1115_v0 = vmov 0.0  }
  0x76   : > { %s1297_s21 = smov 0  }
  0x77 LB: >> { %s1300_s4 = sand.u32 1, %s1121_s21  ;;  %s1121_s21 = sphi %s1297_s21, %s1304_s21   ;;  %v1117_v0 = vphi %v1115_v0, %v1116_v0  }
  0x78   : >> { %s125_s19 = scalar_lea.vmem [#allocation2], %s1300_s4  ;;  %s126_s22 = scalar_lea.sflag [#allocation3], %s1300_s4 }
  0x79   : >> { %1107 = dma.done.wait %s126_s22, 16 }
  0x7a   : >> { %1108 = vsyncadd %s126_s22, 4294967280  ;;  %s1304_s21 = sadd.s32 1, %s1121_s21   ;;  %s135_s8 = ssub.s32 1, %s1300_s4 }
  0x7b   : >> { %p843_p8 = scmp.lt.s32.totalorder %s1304_s21, 8  ;;  %s136_s6 = sshra.s32 %s1304_s21, 7 }
  0x7c   : >> { %s141_s23 = sand.u32 127, %s1304_s21  ;;  %s138_s26 = sadd.s32 %s1113_s24, %s136_s6 }
  0x7d   : >> { %s683_s27 = sshll.u32 %s138_s26, 7  ;;  %s146_s25 = scalar_lea.vmem [#allocation2], %s135_s8 }
  0x7e   : >> { %s142_s28 = sadd.s32 %s683_s27, %s141_s23  ;;  %s155_s12 = sshll.u32 %s146_s25, 4  ;;  %s156_s12 = int_to_ptr.vmem [resolvable:$true] %s155_s12 }
  0x7f   : >> { %s840_s29 = scalar_select %p843_p8, [#allocation6], [#allocation22] }
  0x80   : >> { %s1424_s28 = smov (!%p843_p8, %s142_s28), 0  ;;  %s147_s16 = scalar_lea.sflag [#allocation3], %s135_s8 }
  0x81   : >> { %s143_s30 = sld [smem:[%s840_s29 + %s1424_s28]] }
  0x87   : >> { %s684_s13 = sshll.u32 %s143_s30, 4 }
  0x88   : >> { %s145_s15 = scalar_lea.hbm %s1411_s1, %s684_s13 }
  0x89   : >> { %s1037_s17 = scalar_lea.hbm %s145_s15, 16  ;;  %p1042_p12 = scmp.lt.u32.totalorder %s145_s15, %s1411_s1 }
  0x8a   : >> { %p1038_p9 = scmp.ne.s32.totalorder %s145_s15, %s1037_s17  ;;  %p1043_p13 = scmp.lt.u32.totalorder %s1015_s2, %s1037_s17 }
  0x8b   : >> { %p1045_p1 = scmp.lt.u32.totalorder %s1037_s17, %s145_s15 }
  0x8c   : >> { %p1039_p10 = pnand %p1038_p9, %p843_p8  ;;  %p1044_p0 = por %p1043_p13, %p1042_p12 }
  0x8e   : >> { %p1040_p11 = pneg %p1039_p10  ;;  %p1046_p2 = por %p1045_p1, %p1044_p0 }
  0x90   : >> { %p1047_p3 = pnand %p1046_p2, %p1040_p11 }
  0x92   : >> { %1050 = shalt.err (!%p1047_p3)  }
  0x93   : >> { %s1051_s26 = scalar_lea.vmem %s156_s12, 16  ;;  %p1058_p9 = scmp.lt.s32.totalorder %s156_s12, %s1274_s11 }
  0x94   : >> { %p1052_p4 = scmp.ne.s32.totalorder %s156_s12, %s1051_s26  ;;  %p1059_p10 = scmp.lt.s32.totalorder %s1029_s0, %s1051_s26 }
  0x96   : >> { %p1053_p5 = pnand %p1052_p4, %p843_p8  ;;  %p1060_p7 = por %p1059_p10, %p1058_p9 }
  0x98   : >> { %p1054_p6 = pneg %p1053_p5 }
  0x9a   : >> { %p1061_p12 = pnand %p1060_p7, %p1054_p6 }
  0x9c   : >> { %1064 = shalt.err (!%p1061_p12)  }
  0x9d   : >> { %842 = dma.hbm_to_vmem [thread:$0]  (%p843_p8), %s145_s15, 16, %s156_s12, %s147_s16 }
  0x9e   : >> { %v159_v1 = vld [vmem:[%s125_s19] sm:$0x1]  ;;  %s1421_s27 = smov %s1304_s21 }
  0x9f   : >> { %v160_v2 = vadd.f32 %v1117_v0, %v159_v1   ;;  %p1422_p11 = scmp.ge.s32.totalorder %s1421_s27, 8 }
  0xa0   : > { %s162_s28 = scalar_lea.vmem (%p1422_p11), [#allocation4], %s1113_s24  ;;  %s100_s24 = sadd.s32 (%p1422_p11), 1, %s1113_s24  }
  0xa1   : >> { %v1116_v0 = vmov %v160_v2   ;;  %121 = sbr.rel (!%p1422_p11) target bundleno = 119 (0x77), region = 102  ;;  %v161_v3 = vmul.f32 (%p1422_p11), 0.125, %v160_v2  ;;  %p97_p7 = scmp.ge.s32.totalorder (%p1422_p11), %s100_s24, 16  }
  0xa3   : > { %163 = vst [vmem:[%s162_s28] sm:$0x1] (%p1422_p11), %v161_v3 }
  0xa8   :  { %99 = sbr.rel (!%p97_p7) target bundleno = 89 (0x59), region = 113  ;;  %v881_v4 = vld [vmem:[#allocation7] sm:$0xff] (%p97_p7)   ;;  %v1131_v5 = vmov (%p97_p7), 0.0   ;;  %v882_v6 = vld [vmem:[#allocation7 + $0x8] sm:$0xff] (%p97_p7)   ;;  %vm1132_vm0 = vmmov (%p97_p7), 0   ;;  %v883_v7 = vld [vmem:[#allocation7 + $0x10] sm:$0xff] (%p97_p7)  }
  0xa9   :  { %759 = vmatprep.subr.bf16.mxu0 (%p97_p7), %v1131_v5  ;;  %779 = vmatprep.subr.bf16.mxu1 (%p97_p7), %v1131_v5  ;;  %v889_v8 = vld [vmem:[#allocation10] sm:$0xff] (%p97_p7)   ;;  %v884_v9 = vld [vmem:[#allocation7 + $0x18] sm:$0xff] (%p97_p7)   ;;  %v890_v10 = vld [vmem:[#allocation10 + $0x8] sm:$0xff] (%p97_p7)   ;;  %s1133_s4 = smov (%p97_p7), [#allocation15]  }
  0xaa   :  { %760 = vmatpush3.bf16.msra.mxu0 (%p97_p7), %v881_v4  ;;  %775 = vmatprep.mubr.msk.bf16.mxu0 (%p97_p7), %vm1132_vm0, %v1131_v5  ;;  %v885_v11 = vld [vmem:[#allocation7 + $0x20] sm:$0xff] (%p97_p7)   ;;  %v891_v12 = vld [vmem:[#allocation10 + $0x10] sm:$0xff] (%p97_p7)   ;;  %v886_v13 = vld [vmem:[#allocation7 + $0x28] sm:$0xff] (%p97_p7)   ;;  %s631_s19 = sshll.u32 (%p97_p7), %s1133_s4, 4  ;;  %s632_s19 = int_to_ptr.vmem [resolvable:$true] %s631_s19 }
  0xab   :  { %761 = vmatprep.subr.bf16.mxu0 (%p97_p7), %v1131_v5  ;;  %795 = vmatprep.mubr.msk.bf16.mxu1 (%p97_p7), %vm1132_vm0, %v1131_v5  ;;  %v892_v14 = vld [vmem:[#allocation10 + $0x18] sm:$0xff] (%p97_p7)   ;;  %v887_v15 = vld [vmem:[#allocation7 + $0x30] sm:$0xff] (%p97_p7)   ;;  %v893_v16 = vld [vmem:[#allocation10 + $0x20] sm:$0xff] (%p97_p7)   ;;  %p1070_p13 = scmp.lt.s32.totalorder (%p97_p7), %s632_s19, %s632_s19 }
  0xac   :  { %780 = vmatpush3.bf16.msra.mxu1 (%p97_p7), %v889_v8  ;;  %v888_v17 = vld [vmem:[#allocation7 + $0x38] sm:$0xff] (%p97_p7)   ;;  %v164_v18 = vld [vmem:[#allocation4] sm:$0xff] (%p97_p7)  ;;  %v894_v20 = vld [vmem:[#allocation10 + $0x28] sm:$0xff] (%p97_p7)  }
  0xad   :  { %781 = vmatprep.subr.bf16.mxu1 (%p97_p7), %v1131_v5  ;;  %v165_v19 = vld [vmem:[#allocation4 + $0x8] sm:$0xff] (%p97_p7)  ;;  %v895_v22 = vld [vmem:[#allocation10 + $0x30] sm:$0xff] (%p97_p7)   ;;  %v897_v24 = vld [vmem:[#allocation12] sm:$0xff] (%p97_p7)  }
  0xae   :  { %762 = vmatpush3.bf16.msra.mxu0 (%p97_p7), %v882_v6  ;;  %v166_v21 = vpack.c.bf16 (%p97_p7), %v165_v19, %v164_v18  ;;  %v896_v23 = vld [vmem:[#allocation10 + $0x38] sm:$0xff] (%p97_p7)   ;;  %v898_v25 = vld [vmem:[#allocation12 + $0x8] sm:$0xff] (%p97_p7)   ;;  %v899_v26 = vld [vmem:[#allocation12 + $0x10] sm:$0xff] (%p97_p7)  }
  0xaf   :  { %763 = vmatprep.subr.bf16.mxu0 %v1131_v5  ;;  %v900_v27 = vld [vmem:[#allocation12 + $0x18] sm:$0xff]   ;;  %v901_v28 = vld [vmem:[#allocation12 + $0x20] sm:$0xff]   ;;  %v902_v29 = vld [vmem:[#allocation12 + $0x28] sm:$0xff]  }
  0xb0   :  { %782 = vmatpush3.bf16.msra.mxu1 %v890_v10  ;;  %v685_v30 = vld [vmem:[%s1413_s3] ss:$0 sm:$0xff]  ;;  %v903_v40 = vld [vmem:[#allocation12 + $0x30] sm:$0xff]   ;;  %v905_v42 = vld [vmem:[#allocation13] sm:$0xff]  }
  0xb1   :  { %783 = vmatprep.subr.bf16.mxu1 %v1131_v5  ;;  %v904_v41 = vld [vmem:[#allocation12 + $0x38] sm:$0xff]   ;;  %v906_v43 = vld [vmem:[#allocation13 + $0x8] sm:$0xff]   ;;  %v907_v44 = vld [vmem:[#allocation13 + $0x10] sm:$0xff]  }
  0xb2   :  { %764 = vmatpush3.bf16.msra.mxu0 %v883_v7  ;;  %v908_v45 = vld [vmem:[#allocation13 + $0x18] sm:$0xff]   ;;  %v909_v46 = vld [vmem:[#allocation13 + $0x20] sm:$0xff]   ;;  %v910_v47 = vld [vmem:[#allocation13 + $0x28] sm:$0xff]  }
  0xb3   :  { %765 = vmatprep.subr.bf16.mxu0 %v1131_v5  ;;  %v694_v48 = vld [vmem:[%s1415_s5] ss:$0 sm:$0xff]  ;;  %v911_v58 = vld [vmem:[#allocation13 + $0x30] sm:$0xff]  }
  0xb4   :  { %784 = vmatpush3.bf16.msra.mxu1 %v891_v12  ;;  %v912_v59 = vld [vmem:[#allocation13 + $0x38] sm:$0xff]  }
  0xb5   :  { %785 = vmatprep.subr.bf16.mxu1 %v1131_v5  ;;  %v703_v60 = vld [vmem:[%s1417_s7] ss:$0 sm:$0xff]  ;;  %s1065_s7 = scalar_lea.vmem %s632_s19, 256 }
  0xb6   :  { %766 = vmatpush3.bf16.msra.mxu0 %v884_v9  ;;  %p1066_p8 = scmp.ne.s32.totalorder %s632_s19, %s1065_s7  ;;  %p1071_p0 = scmp.lt.s32.totalorder %s1065_s7, %s1065_s7 }
  0xb7   :  { %767 = vmatprep.subr.bf16.mxu0 %v1131_v5 }
  0xb8   :  { %786 = vmatpush3.bf16.msra.mxu1 %v892_v14  ;;  %p1072_p1 = por %p1071_p0, %p1070_p13 }
  0xb9   :  { %787 = vmatprep.subr.bf16.mxu1 %v1131_v5 }
  0xba   :  { %768 = vmatpush3.bf16.msra.mxu0 %v885_v11  ;;  %p1073_p2 = pnand %p1072_p1, %p1066_p8 }
  0xbb   :  { %769 = vmatprep.subr.bf16.mxu0 %v1131_v5 }
  0xbc   :  { %788 = vmatpush3.bf16.msra.mxu1 %v893_v16 }
  0xbd   :  { %789 = vmatprep.subr.bf16.mxu1 %v1131_v5 }
  0xbe   :  { %770 = vmatpush3.bf16.msra.mxu0 %v886_v13 }
  0xbf   :  { %771 = vmatprep.subr.bf16.mxu0 %v1131_v5 }
  0xc0   :  { %790 = vmatpush3.bf16.msra.mxu1 %v894_v20 }
  0xc1   :  { %791 = vmatprep.subr.bf16.mxu1 %v1131_v5 }
  0xc2   :  { %772 = vmatpush3.bf16.msra.mxu0 %v887_v15 }
  0xc3   :  { %773 = vmatprep.subr.bf16.mxu0 %v1131_v5 }
  0xc4   :  { %792 = vmatpush3.bf16.msra.mxu1 %v895_v22 }
  0xc5   :  { %793 = vmatprep.subr.bf16.mxu1 %v1131_v5 }
  0xc6   :  { %774 = vmatpush3.bf16.msra.mxu0 %v888_v17 }
  0xc7   :  { %799 = vmatprep.subr.bf16.mxu0 %v1131_v5 }
  0xc8   :  { %794 = vmatpush3.bf16.msra.mxu1 %v896_v23 }
  0xc9   :  { %776 = vmatmul.mubr.bf16.vlgmr.msra.gmra.mrb[0].mxu0 %v166_v21  ;;  %819 = vmatprep.subr.bf16.mxu1 %v1131_v5 }
  0xca   :  { %815 = vmatprep.mubr.msk.bf16.mxu0 %vm1132_vm0, %v1131_v5  ;;  %800 = vmatpush3.bf16.msra.mxu0 %v897_v24 }
  0xcb   :  { %801 = vmatprep.subr.bf16.mxu0 %v1131_v5 }
  0xce   :  { %802 = vmatpush3.bf16.msra.mxu0 %v898_v25 }
  0xcf   :  { %803 = vmatprep.subr.bf16.mxu0 %v1131_v5 }
  0xd2   :  { %804 = vmatpush3.bf16.msra.mxu0 %v899_v26 }
  0xd3   :  { %805 = vmatprep.subr.bf16.mxu0 %v1131_v5 }
  0xd6   :  { %806 = vmatpush3.bf16.msra.mxu0 %v900_v27 }
  0xd7   :  { %807 = vmatprep.subr.bf16.mxu0 %v1131_v5 }
  0xda   :  { %808 = vmatpush3.bf16.msra.mxu0 %v901_v28 }
  0xdb   :  { %809 = vmatprep.subr.bf16.mxu0 %v1131_v5 }
  0xde   :  { %810 = vmatpush3.bf16.msra.mxu0 %v902_v29 }
  0xdf   :  { %811 = vmatprep.subr.bf16.mxu0 %v1131_v5 }
  0xe2   :  { %812 = vmatpush3.bf16.msra.mxu0 %v903_v40 }
  0xe3   :  { %813 = vmatprep.subr.bf16.mxu0 %v1131_v5 }
  0xe6   :  { %814 = vmatpush3.bf16.msra.mxu0 %v904_v41 }
 0x19c   :  { %v272_v31 = vpop.f32.mrb[0].mxu0 }
 0x19d   :  { %v273_v32 = vadd.f32 %v685_v30, %v272_v31  ;;  %v777_v33 = vpop.f32.mrb[1].mxu0 }
 0x19e   :  { %v275_v34 = vpop.f32.mrb[2].mxu0 }
 0x19f   :  { %v276_v35 = vadd.f32 %v685_v30, %v275_v34  ;;  %v778_v36 = vpop.f32.mrb[3].mxu0  ;;  %v279_v37 = vmax.f32 %v273_v32, 0.0 }
 0x1a1   :  { %v280_v38 = vmax.f32 %v276_v35, 0.0 }
 0x1a3   :  { %v281_v39 = vpack.c.bf16 %v280_v38, %v279_v37 }
 0x1a5   :  { %796 = vmatmul.mubr.bf16.vlgmr.msra.gmra.mrb[0].mxu1 %v281_v39 }
 0x1a6   :  { %835 = vmatprep.mubr.msk.bf16.mxu1 %vm1132_vm0, %v1131_v5  ;;  %820 = vmatpush3.bf16.msra.mxu1 %v905_v42 }
 0x1a7   :  { %821 = vmatprep.subr.bf16.mxu1 %v1131_v5 }
 0x1aa   :  { %822 = vmatpush3.bf16.msra.mxu1 %v906_v43 }
 0x1ab   :  { %823 = vmatprep.subr.bf16.mxu1 %v1131_v5 }
 0x1ae   :  { %824 = vmatpush3.bf16.msra.mxu1 %v907_v44 }
 0x1af   :  { %825 = vmatprep.subr.bf16.mxu1 %v1131_v5 }
 0x1b2   :  { %826 = vmatpush3.bf16.msra.mxu1 %v908_v45 }
 0x1b3   :  { %827 = vmatprep.subr.bf16.mxu1 %v1131_v5 }
 0x1b6   :  { %828 = vmatpush3.bf16.msra.mxu1 %v909_v46 }
 0x1b7   :  { %829 = vmatprep.subr.bf16.mxu1 %v1131_v5 }
 0x1ba   :  { %830 = vmatpush3.bf16.msra.mxu1 %v910_v47 }
 0x1bb   :  { %831 = vmatprep.subr.bf16.mxu1 %v1131_v5 }
 0x1be   :  { %832 = vmatpush3.bf16.msra.mxu1 %v911_v58 }
 0x1bf   :  { %833 = vmatprep.subr.bf16.mxu1 %v1131_v5  ;;  %v712_v5 = vld [vmem:[%s1419_s9] ss:$0 sm:$0xff] }
 0x1c2   :  { %834 = vmatpush3.bf16.msra.mxu1 %v912_v59 }
 0x278   :  { %v387_v49 = vpop.f32.mrb[0].mxu1 }
 0x279   :  { %v388_v50 = vadd.f32 %v694_v48, %v387_v49  ;;  %v797_v51 = vpop.f32.mrb[1].mxu1 }
 0x27a   :  { %v390_v52 = vpop.f32.mrb[2].mxu1 }
 0x27b   :  { %v391_v53 = vadd.f32 %v694_v48, %v390_v52  ;;  %v798_v54 = vpop.f32.mrb[3].mxu1  ;;  %v394_v55 = vmax.f32 %v388_v50, 0.0 }
 0x27d   :  { %v395_v56 = vmax.f32 %v391_v53, 0.0 }
 0x27f   :  { %v396_v57 = vpack.c.bf16 %v395_v56, %v394_v55 }
 0x281   :  { %816 = vmatmul.mubr.bf16.vlgmr.msra.gmra.mrb[4].mxu0 %v396_v57 }
 0x354   :  { %v502_v61 = vpop.f32.mrb[4].mxu0 }
 0x355   :  { %v503_v62 = vadd.f32 %v703_v60, %v502_v61  ;;  %v817_v63 = vpop.f32.mrb[5].mxu0 }
 0x356   :  { %v505_v0 = vpop.f32.mrb[6].mxu0 }
 0x357   :  { %v506_v1 = vadd.f32 %v703_v60, %v505_v0  ;;  %v818_v2 = vpop.f32.mrb[7].mxu0  ;;  %v509_v3 = vmax.f32 %v503_v62, 0.0 }
 0x359   :  { %v510_v4 = vmax.f32 %v506_v1, 0.0 }
 0x35b   :  { %v511_v6 = vpack.c.bf16 %v510_v4, %v509_v3 }
 0x35d   :  { %836 = vmatmul.mubr.bf16.vlgmr.msra.gmra.mrb[4].mxu1 %v511_v6 }
 0x430   :  { %v617_v7 = vpop.f32.mrb[4].mxu1 }
 0x431   :  { %v618_v8 = vadd.f32 %v712_v5, %v617_v7  ;;  %v837_v9 = vpop.f32.mrb[5].mxu1 }
 0x432   :  { %v620_v10 = vpop.f32.mrb[6].mxu1 }
 0x433   :  { %624 = vst [vmem:[#allocation15] sm:$0xff] %v618_v8  ;;  %v621_v11 = vadd.f32 %v712_v5, %v620_v10  ;;  %v838_v12 = vpop.f32.mrb[7].mxu1 }
 0x435   :  { %625 = vst [vmem:[#allocation15 + $0x8] sm:$0xff] %v621_v11 }
 0x436   :  { %1076 = shalt.err (!%p1073_p2)
}
 0x437   :  { %s1077_s29 = scalar_lea.hbm %s1420_s10, 256 }
 0x438   :  { %p1078_p3 = scmp.ne.s32.totalorder %s1420_s10, %s1077_s29  ;;  %p1081_p4 = scmp.lt.u32.totalorder %s1077_s29, %s1420_s10 }
 0x43a   :  { %p1083_p5 = pnand %p1081_p4, %p1078_p3 }
 0x43c   :  { %1086 = shalt.err (!%p1083_p5)
}
 0x43d   :  { %s1134_s14 = smov 128   ;;  %s1135_s20 = smov 8  }
 0x43e   :  { %637 = dma.vmem_to_hbm [thread:$0]  %s632_s19, 256, %s1420_s10, [#allocation9], %s1134_s14, %s1134_s14, %s1135_s20  }
 0x43f   :  { %1109 = dma.done.wait [#allocation9], 256  }
 0x440   :  { %1110 = vsyncadd [#allocation9], 4294967040 }
 0x441   :  { %641 = vsyncpa [#allocation8], 1 }
 0x442   :  { %642 = vsyncpa [#allocation11], 1 }
 0x443   :  { %643 = vsyncpa [#allocation14], 1 }
 0x444   :  { %644 = vsyncpa [#allocation9], 1 }
 0x445   :  { %645 = vsyncmov [#allocation3] }
 0x448   :  { %s646_s17 = vpop.sfrf %645 }
 0x449   :  { %p721_p6 = scmp.ne.s32.totalorder %s646_s17, 0 }
 0x44b   :  { %650 = shalt.err (%p721_p6)  }
 0x44c   :  { %652 = vsyncmov [#allocation3 + $0x1] }
 0x44f   :  { %s653_s18 = vpop.sfrf %652 }
 0x450   :  { %p722_p9 = scmp.ne.s32.totalorder %s653_s18, 0 }
 0x452   :  { %657 = shalt.err (%p722_p9)  }

// kernel: tpu_custom_call.1
= control target key start
LH: loop header
LB: loop body
LE: loop exit
PB: predicated region body
PF: predicated region fallthrough
CT: control target
= control target key end

     0   :  { %s1410_s0 = inlined_call_operand.vmem [shape: s32[16,8], index: 0, kind: input, shape index: {}]   ;;  %s1411_s1 = inlined_call_operand.hbm [shape: f32[32,128], index: 1, kind: input, shape index: {}]   ;;  %s1412_s2 = inlined_call_operand.hbm [shape: bf16[128,128], index: 2, kind: input, shape index: {}]   ;;  %s1413_s3 = inlined_call_operand.vmem [shape: f32[1,128], index: 3, kind: input, shape index: {}]   ;;  %s1414_s4 = inlined_call_operand.hbm [shape: bf16[128,128], index: 4, kind: input, shape index: {}]   ;;  %s1415_s5 = inlined_call_operand.vmem [shape: f32[1,128], index: 5, kind: input, shape index: {}]   ;;  %s1416_s6 = inlined_call_operand.hbm [shape: bf16[128,128], index: 6, kind: input, shape index: {}]   ;;  %s1417_s7 = inlined_call_operand.vmem [shape: f32[1,128], index: 7, kind: input, shape index: {}]   ;;  %s1418_s8 = inlined_call_operand.hbm [shape: bf16[128,128], index: 8, kind: input, shape index: {}]   ;;  %s1419_s9 = inlined_call_operand.vmem [shape: f32[1,128], index: 9, kind: input, shape index: {}]   ;;  %s1420_s10 = inlined_call_operand.hbm [shape: f32[16,128], index: 10, kind: output, shape index: {}]  }
   0x1   :  { %s15_s15 = sshll.u32 %s1410_s0, 4  ;;  %s16_s15 = int_to_ptr.vmem [resolvable:$true] %s15_s15 }
   0x2   :  { %s913_s16 = scalar_lea.vmem %s16_s15, 256  ;;  %p918_p1 = scmp.lt.s32.totalorder %s16_s15, %s16_s15 }
   0x3   :  { %p914_p0 = scmp.ne.s32.totalorder %s16_s15, %s913_s16  ;;  %p919_p2 = scmp.lt.s32.totalorder %s913_s16, %s913_s16 }
   0x5   :  { %p920_p3 = por %p919_p2, %p918_p1 }
   0x7   :  { %p921_p4 = pnand %p920_p3, %p914_p0 }
   0x9   :  { %924 = shalt.err (!%p921_p4)  }
   0xa   :  { %s1123_s17 = smov [#allocation6]  }
   0xb   :  { %18 = dma.vmem_to_smem %s16_s15, 256, %s1123_s17, [#allocation5] }
   0xc   :  { %1099 = dma.done.wait [#allocation5], 256 }
   0xd   :  { %1100 = vsyncadd [#allocation5], 4294967040 }
   0xe   :  { %20 = sfence }
   0xf   :  { %21 = vsyncpa [#allocation8], 0 }
  0x10   :  { %22 = vsyncpa [#allocation11], 0 }
  0x11   :  { %23 = vsyncpa [#allocation14], 0 }
  0x12   :  { %24 = vsyncpa [#allocation9], 0  ;;  %s1124_s18 = smov [#allocation10]   ;;  %s1125_s0 = smov [#allocation7]  }
  0x13   :  { %s44_s19 = sshll.u32 %s1124_s18, 4  ;;  %s30_s20 = sshll.u32 %s1125_s0, 4  ;;  %s45_s19 = int_to_ptr.vmem [resolvable:$true] %s44_s19  ;;  %s1194_s20 = int_to_ptr.vmem [resolvable:$true] %s30_s20 }
  0x14   :  { %s925_s23 = scalar_lea.hbm %s1414_s4, 1024 }
  0x15   :  { %p926_p5 = scmp.ne.s32.totalorder %s1414_s4, %s925_s23  ;;  %p929_p6 = scmp.lt.u32.totalorder %s925_s23, %s1414_s4 }
  0x17   :  { %p931_p7 = pnand %p929_p6, %p926_p5 }
  0x19   :  { %934 = shalt.err (!%p931_p7)
}
  0x1a   :  { %s935_s28 = scalar_lea.vmem %s45_s19, 1024  ;;  %p940_p9 = scmp.lt.s32.totalorder %s45_s19, %s45_s19 }
  0x1b   :  { %p936_p8 = scmp.ne.s32.totalorder %s45_s19, %s935_s28  ;;  %p941_p10 = scmp.lt.s32.totalorder %s935_s28, %s935_s28 }
  0x1d   :  { %p942_p11 = por %p941_p10, %p940_p9 }
  0x1f   :  { %p943_p12 = pnand %p942_p11, %p936_p8 }
  0x21   :  { %946 = shalt.err (!%p943_p12)
}
  0x22   :  { %s1126_s29 = smov 64   ;;  %s1127_s30 = smov 4  }
  0x23   :  { %50 = dma.hbm_to_vmem [thread:$0]  %s1414_s4, 1024, %s45_s19, [#allocation11], %s1126_s29, %s1126_s29, %s1127_s30  }
  0x24   :  { %s947_s15 = scalar_lea.hbm %s1412_s2, 1024 }
  0x25   :  { %p948_p13 = scmp.ne.s32.totalorder %s1412_s2, %s947_s15  ;;  %p951_p0 = scmp.lt.u32.totalorder %s947_s15, %s1412_s2 }
  0x27   :  { %p953_p1 = pnand %p951_p0, %p948_p13 }
  0x29   :  { %956 = shalt.err (!%p953_p1)
}
  0x2a   :  { %s957_s21 = scalar_lea.vmem %s1194_s20, 1024  ;;  %p962_p3 = scmp.lt.s32.totalorder %s1194_s20, %s1194_s20 }
  0x2b   :  { %p958_p2 = scmp.ne.s32.totalorder %s1194_s20, %s957_s21  ;;  %p963_p4 = scmp.lt.s32.totalorder %s957_s21, %s957_s21 }
  0x2d   :  { %p964_p5 = por %p963_p4, %p962_p3 }
  0x2f   :  { %p965_p6 = pnand %p964_p5, %p958_p2 }
  0x31   :  { %968 = shalt.err (!%p965_p6)
}
  0x32   :  { %36 = dma.hbm_to_vmem [thread:$0]  %s1412_s2, 1024, %s1194_s20, [#allocation8], %s1126_s29, %s1126_s29, %s1127_s30  }
  0x33   :  { %s1128_s22 = smov [#allocation12]   ;;  %s1129_s24 = smov [#allocation13]  }
  0x34   :  { %s58_s23 = sshll.u32 %s1128_s22, 4  ;;  %s72_s25 = sshll.u32 %s1129_s24, 4  ;;  %s59_s23 = int_to_ptr.vmem [resolvable:$true] %s58_s23  ;;  %s1231_s25 = int_to_ptr.vmem [resolvable:$true] %s72_s25 }
  0x35   :  { %s969_s28 = scalar_lea.hbm %s1416_s6, 1024 }
  0x36   :  { %p970_p7 = scmp.ne.s32.totalorder %s1416_s6, %s969_s28  ;;  %p973_p8 = scmp.lt.u32.totalorder %s969_s28, %s1416_s6 }
  0x38   :  { %p975_p9 = pnand %p973_p8, %p970_p7 }
  0x3a   :  { %978 = shalt.err (!%p975_p9)
}
  0x3b   :  { %s979_s2 = scalar_lea.vmem %s59_s23, 1024  ;;  %p984_p11 = scmp.lt.s32.totalorder %s59_s23, %s59_s23 }
  0x3c   :  { %p980_p10 = scmp.ne.s32.totalorder %s59_s23, %s979_s2  ;;  %p985_p12 = scmp.lt.s32.totalorder %s979_s2, %s979_s2 }
  0x3e   :  { %p986_p13 = por %p985_p12, %p984_p11 }
  0x40   :  { %p987_p0 = pnand %p986_p13, %p980_p10 }
  0x42   :  { %990 = shalt.err (!%p987_p0)
}
  0x43   :  { %64 = dma.hbm_to_vmem [thread:$0]  %s1416_s6, 1024, %s59_s23, [#allocation11], %s1126_s29, %s1126_s29, %s1127_s30  }
  0x44   :  { %s991_s18 = scalar_lea.hbm %s1418_s8, 1024 }
  0x45   :  { %p992_p1 = scmp.ne.s32.totalorder %s1418_s8, %s991_s18  ;;  %p995_p2 = scmp.lt.u32.totalorder %s991_s18, %s1418_s8 }
  0x47   :  { %p997_p3 = pnand %p995_p2, %p992_p1 }
  0x49   :  { %1000 = shalt.err (!%p997_p3)
}
  0x4a   :  { %s1001_s22 = scalar_lea.vmem %s1231_s25, 1024  ;;  %p1006_p5 = scmp.lt.s32.totalorder %s1231_s25, %s1231_s25 }
  0x4b   :  { %p1002_p4 = scmp.ne.s32.totalorder %s1231_s25, %s1001_s22  ;;  %p1007_p6 = scmp.lt.s32.totalorder %s1001_s22, %s1001_s22 }
  0x4d   :  { %p1008_p7 = por %p1007_p6, %p1006_p5 }
  0x4f   :  { %p1009_p8 = pnand %p1008_p7, %p1002_p4 }
  0x51   :  { %1012 = shalt.err (!%p1009_p8)
}
  0x52   :  { %78 = dma.hbm_to_vmem [thread:$0]  %s1418_s8, 1024, %s1231_s25, [#allocation14], %s1126_s29, %s1126_s29, %s1127_s30  }
  0x53   :  { %1101 = dma.done.wait [#allocation8], 1024  }
  0x54   :  { %1102 = vsyncadd [#allocation8], 4294966272 }
  0x55   :  { %1103 = dma.done.wait [#allocation11], 2048  }
  0x56   :  { %1104 = vsyncadd [#allocation11], 4294965248 }
  0x57   :  { %1105 = dma.done.wait [#allocation14], 1024  }
  0x58   :  { %1106 = vsyncadd [#allocation14], 4294966272  ;;  %s1268_s24 = smov 0  }
  0x59 LB: > { %s680_s26 = sshll.u32 %s1113_s24, 7  ;;  %s1130_s28 = smov [#allocation2]   ;;  %s1113_s24 = sphi %s1268_s24, %s100_s24  }
  0x5a   : > { %s103_s27 = sld [smem:[#allocation6 + %s680_s26]]  ;;  %s113_s11 = sshll.u32 %s1130_s28, 4  ;;  %s1274_s11 = int_to_ptr.vmem [resolvable:$true] %s113_s11 }
  0x5b   : > { %s1015_s2 = scalar_lea.hbm %s1411_s1, 512 }
  0x60   : > { %s681_s8 = sshll.u32 %s103_s27, 4 }
  0x61   : > { %s105_s25 = scalar_lea.hbm %s1411_s1, %s681_s8 }
  0x62   : > { %s1013_s12 = scalar_lea.hbm %s105_s25, 16  ;;  %p1016_p10 = scmp.lt.u32.totalorder %s105_s25, %s1411_s1 }
  0x63   : > { %p1014_p9 = scmp.ne.s32.totalorder %s105_s25, %s1013_s12  ;;  %p1017_p11 = scmp.lt.u32.totalorder %s1015_s2, %s1013_s12 }
  0x64   : > { %p1019_p13 = scmp.lt.u32.totalorder %s1013_s12, %s105_s25 }
  0x65   : > { %p1018_p12 = por %p1017_p11, %p1016_p10 }
  0x67   : > { %p1020_p0 = por %p1019_p13, %p1018_p12 }
  0x69   : > { %p1021_p1 = pnand %p1020_p0, %p1014_p9 }
  0x6b   : > { %1024 = shalt.err (!%p1021_p1)  }
  0x6c   : > { %s1025_s18 = scalar_lea.vmem %s1274_s11, 16  ;;  %s1029_s0 = scalar_lea.vmem %s1274_s11, 32 }
  0x6d   : > { %p1026_p2 = scmp.ne.s32.totalorder %s1274_s11, %s1025_s18  ;;  %p1030_p3 = scmp.lt.s32.totalorder %s1274_s11, %s1274_s11 }
  0x6e   : > { %p1031_p4 = scmp.lt.s32.totalorder %s1029_s0, %s1025_s18 }
  0x70   : > { %p1032_p5 = por %p1031_p4, %p1030_p3 }
  0x72   : > { %p1033_p6 = pnand %p1032_p5, %p1026_p2 }
  0x74   : > { %1036 = shalt.err (!%p1033_p6)  }
  0x75   : > { %116 = dma.hbm_to_vmem [thread:$0]  %s105_s25, 16, %s1274_s11, [#allocation3]  ;;  %v1115_v0 = vmov 0.0  }
  0x76   : > { %s1297_s21 = smov 0  }
  0x77 LB: >> { %s1300_s4 = sand.u32 1, %s1121_s21  ;;  %s1121_s21 = sphi %s1297_s21, %s1304_s21   ;;  %v1117_v0 = vphi %v1115_v0, %v1116_v0  }
  0x78   : >> { %s125_s19 = scalar_lea.vmem [#allocation2], %s1300_s4  ;;  %s126_s22 = scalar_lea.sflag [#allocation3], %s1300_s4 }
  0x79   : >> { %1107 = dma.done.wait %s126_s22, 16 }
  0x7a   : >> { %1108 = vsyncadd %s126_s22, 4294967280  ;;  %s1304_s21 = sadd.s32 1, %s1121_s21   ;;  %s135_s8 = ssub.s32 1, %s1300_s4 }
  0x7b   : >> { %p843_p8 = scmp.lt.s32.totalorder %s1304_s21, 8  ;;  %s136_s6 = sshra.s32 %s1304_s21, 7 }
  0x7c   : >> { %s141_s23 = sand.u32 127, %s1304_s21  ;;  %s138_s26 = sadd.s32 %s1113_s24, %s136_s6 }
  0x7d   : >> { %s683_s27 = sshll.u32 %s138_s26, 7  ;;  %s146_s25 = scalar_lea.vmem [#allocation2], %s135_s8 }
  0x7e   : >> { %s142_s28 = sadd.s32 %s683_s27, %s141_s23  ;;  %s155_s12 = sshll.u32 %s146_s25, 4  ;;  %s156_s12 = int_to_ptr.vmem [resolvable:$true] %s155_s12 }
  0x7f   : >> { %s840_s29 = scalar_select %p843_p8, [#allocation6], [#allocation22] }
  0x80   : >> { %s1424_s28 = smov (!%p843_p8, %s142_s28), 0  ;;  %s147_s16 = scalar_lea.sflag [#allocation3], %s135_s8 }
  0x81   : >> { %s143_s30 = sld [smem:[%s840_s29 + %s1424_s28]] }
  0x87   : >> { %s684_s13 = sshll.u32 %s143_s30, 4 }
  0x88   : >> { %s145_s15 = scalar_lea.hbm %s1411_s1, %s684_s13 }
  0x89   : >> { %s1037_s17 = scalar_lea.hbm %s145_s15, 16  ;;  %p1042_p12 = scmp.lt.u32.totalorder %s145_s15, %s1411_s1 }
  0x8a   : >> { %p1038_p9 = scmp.ne.s32.totalorder %s145_s15, %s1037_s17  ;;  %p1043_p13 = scmp.lt.u32.totalorder %s1015_s2, %s1037_s17 }
  0x8b   : >> { %p1045_p1 = scmp.lt.u32.totalorder %s1037_s17, %s145_s15 }
  0x8c   : >> { %p1039_p10 = pnand %p1038_p9, %p843_p8  ;;  %p1044_p0 = por %p1043_p13, %p1042_p12 }
  0x8e   : >> { %p1040_p11 = pneg %p1039_p10  ;;  %p1046_p2 = por %p1045_p1, %p1044_p0 }
  0x90   : >> { %p1047_p3 = pnand %p1046_p2, %p1040_p11 }
  0x92   : >> { %1050 = shalt.err (!%p1047_p3)  }
  0x93   : >> { %s1051_s26 = scalar_lea.vmem %s156_s12, 16  ;;  %p1058_p9 = scmp.lt.s32.totalorder %s156_s12, %s1274_s11 }
  0x94   : >> { %p1052_p4 = scmp.ne.s32.totalorder %s156_s12, %s1051_s26  ;;  %p1059_p10 = scmp.lt.s32.totalorder %s1029_s0, %s1051_s26 }
  0x96   : >> { %p1053_p5 = pnand %p1052_p4, %p843_p8  ;;  %p1060_p7 = por %p1059_p10, %p1058_p9 }
  0x98   : >> { %p1054_p6 = pneg %p1053_p5 }
  0x9a   : >> { %p1061_p12 = pnand %p1060_p7, %p1054_p6 }
  0x9c   : >> { %1064 = shalt.err (!%p1061_p12)  }
  0x9d   : >> { %842 = dma.hbm_to_vmem [thread:$0]  (%p843_p8), %s145_s15, 16, %s156_s12, %s147_s16 }
  0x9e   : >> { %v159_v1 = vld [vmem:[%s125_s19] sm:$0x1]  ;;  %s1421_s27 = smov %s1304_s21 }
  0x9f   : >> { %v160_v2 = vadd.f32 %v1117_v0, %v159_v1   ;;  %p1422_p11 = scmp.ge.s32.totalorder %s1421_s27, 8 }
  0xa0   : > { %s162_s28 = scalar_lea.vmem (%p1422_p11), [#allocation4], %s1113_s24  ;;  %s100_s24 = sadd.s32 (%p1422_p11), 1, %s1113_s24  }
  0xa1   : >> { %v1116_v0 = vmov %v160_v2   ;;  %121 = sbr.rel (!%p1422_p11) target bundleno = 119 (0x77), region = 102  ;;  %v161_v3 = vmul.f32 (%p1422_p11), 0.125, %v160_v2  ;;  %p97_p7 = scmp.ge.s32.totalorder (%p1422_p11), %s100_s24, 16  }
  0xa3   : > { %163 = vst [vmem:[%s162_s28] sm:$0x1] (%p1422_p11), %v161_v3 }
  0xa8   :  { %99 = sbr.rel (!%p97_p7) target bundleno = 89 (0x59), region = 113  ;;  %v881_v4 = vld [vmem:[#allocation7] sm:$0xff] (%p97_p7)   ;;  %v1131_v5 = vmov (%p97_p7), 0.0   ;;  %v882_v6 = vld [vmem:[#allocation7 + $0x8] sm:$0xff] (%p97_p7)   ;;  %vm1132_vm0 = vmmov (%p97_p7), 0   ;;  %v883_v7 = vld [vmem:[#allocation7 + $0x10] sm:$0xff] (%p97_p7)  }
  0xa9   :  { %759 = vmatprep.subr.bf16.mxu0 (%p97_p7), %v1131_v5  ;;  %779 = vmatprep.subr.bf16.mxu1 (%p97_p7), %v1131_v5  ;;  %v889_v8 = vld [vmem:[#allocation10] sm:$0xff] (%p97_p7)   ;;  %v884_v9 = vld [vmem:[#allocation7 + $0x18] sm:$0xff] (%p97_p7)   ;;  %v890_v10 = vld [vmem:[#allocation10 + $0x8] sm:$0xff] (%p97_p7)   ;;  %s1133_s4 = smov (%p97_p7), [#allocation15]  }
  0xaa   :  { %760 = vmatpush3.bf16.msra.mxu0 (%p97_p7), %v881_v4  ;;  %775 = vmatprep.mubr.msk.bf16.mxu0 (%p97_p7), %vm1132_vm0, %v1131_v5  ;;  %v885_v11 = vld [vmem:[#allocation7 + $0x20] sm:$0xff] (%p97_p7)   ;;  %v891_v12 = vld [vmem:[#allocation10 + $0x10] sm:$0xff] (%p97_p7)   ;;  %v886_v13 = vld [vmem:[#allocation7 + $0x28] sm:$0xff] (%p97_p7)   ;;  %s631_s19 = sshll.u32 (%p97_p7), %s1133_s4, 4  ;;  %s632_s19 = int_to_ptr.vmem [resolvable:$true] %s631_s19 }
  0xab   :  { %761 = vmatprep.subr.bf16.mxu0 (%p97_p7), %v1131_v5  ;;  %795 = vmatprep.mubr.msk.bf16.mxu1 (%p97_p7), %vm1132_vm0, %v1131_v5  ;;  %v892_v14 = vld [vmem:[#allocation10 + $0x18] sm:$0xff] (%p97_p7)   ;;  %v887_v15 = vld [vmem:[#allocation7 + $0x30] sm:$0xff] (%p97_p7)   ;;  %v893_v16 = vld [vmem:[#allocation10 + $0x20] sm:$0xff] (%p97_p7)   ;;  %p1070_p13 = scmp.lt.s32.totalorder (%p97_p7), %s632_s19, %s632_s19 }
  0xac   :  { %780 = vmatpush3.bf16.msra.mxu1 (%p97_p7), %v889_v8  ;;  %v888_v17 = vld [vmem:[#allocation7 + $0x38] sm:$0xff] (%p97_p7)   ;;  %v164_v18 = vld [vmem:[#allocation4] sm:$0xff] (%p97_p7)  ;;  %v894_v20 = vld [vmem:[#allocation10 + $0x28] sm:$0xff] (%p97_p7)  }
  0xad   :  { %781 = vmatprep.subr.bf16.mxu1 (%p97_p7), %v1131_v5  ;;  %v165_v19 = vld [vmem:[#allocation4 + $0x8] sm:$0xff] (%p97_p7)  ;;  %v895_v22 = vld [vmem:[#allocation10 + $0x30] sm:$0xff] (%p97_p7)   ;;  %v897_v24 = vld [vmem:[#allocation12] sm:$0xff] (%p97_p7)  }
  0xae   :  { %762 = vmatpush3.bf16.msra.mxu0 (%p97_p7), %v882_v6  ;;  %v166_v21 = vpack.c.bf16 (%p97_p7), %v165_v19, %v164_v18  ;;  %v896_v23 = vld [vmem:[#allocation10 + $0x38] sm:$0xff] (%p97_p7)   ;;  %v898_v25 = vld [vmem:[#allocation12 + $0x8] sm:$0xff] (%p97_p7)   ;;  %v899_v26 = vld [vmem:[#allocation12 + $0x10] sm:$0xff] (%p97_p7)  }
  0xaf   :  { %763 = vmatprep.subr.bf16.mxu0 %v1131_v5  ;;  %v900_v27 = vld [vmem:[#allocation12 + $0x18] sm:$0xff]   ;;  %v901_v28 = vld [vmem:[#allocation12 + $0x20] sm:$0xff]   ;;  %v902_v29 = vld [vmem:[#allocation12 + $0x28] sm:$0xff]  }
  0xb0   :  { %782 = vmatpush3.bf16.msra.mxu1 %v890_v10  ;;  %v685_v30 = vld [vmem:[%s1413_s3] ss:$0 sm:$0xff]  ;;  %v903_v40 = vld [vmem:[#allocation12 + $0x30] sm:$0xff]   ;;  %v905_v42 = vld [vmem:[#allocation13] sm:$0xff]  }
  0xb1   :  { %783 = vmatprep.subr.bf16.mxu1 %v1131_v5  ;;  %v904_v41 = vld [vmem:[#allocation12 + $0x38] sm:$0xff]   ;;  %v906_v43 = vld [vmem:[#allocation13 + $0x8] sm:$0xff]   ;;  %v907_v44 = vld [vmem:[#allocation13 + $0x10] sm:$0xff]  }
  0xb2   :  { %764 = vmatpush3.bf16.msra.mxu0 %v883_v7  ;;  %v908_v45 = vld [vmem:[#allocation13 + $0x18] sm:$0xff]   ;;  %v909_v46 = vld [vmem:[#allocation13 + $0x20] sm:$0xff]   ;;  %v910_v47 = vld [vmem:[#allocation13 + $0x28] sm:$0xff]  }
  0xb3   :  { %765 = vmatprep.subr.bf16.mxu0 %v1131_v5  ;;  %v694_v48 = vld [vmem:[%s1415_s5] ss:$0 sm:$0xff]  ;;  %v911_v58 = vld [vmem:[#allocation13 + $0x30] sm:$0xff]  }
  0xb4   :  { %784 = vmatpush3.bf16.msra.mxu1 %v891_v12  ;;  %v912_v59 = vld [vmem:[#allocation13 + $0x38] sm:$0xff]  }
  0xb5   :  { %785 = vmatprep.subr.bf16.mxu1 %v1131_v5  ;;  %v703_v60 = vld [vmem:[%s1417_s7] ss:$0 sm:$0xff]  ;;  %s1065_s7 = scalar_lea.vmem %s632_s19, 256 }
  0xb6   :  { %766 = vmatpush3.bf16.msra.mxu0 %v884_v9  ;;  %p1066_p8 = scmp.ne.s32.totalorder %s632_s19, %s1065_s7  ;;  %p1071_p0 = scmp.lt.s32.totalorder %s1065_s7, %s1065_s7 }
  0xb7   :  { %767 = vmatprep.subr.bf16.mxu0 %v1131_v5 }
  0xb8   :  { %786 = vmatpush3.bf16.msra.mxu1 %v892_v14  ;;  %p1072_p1 = por %p1071_p0, %p1070_p13 }
  0xb9   :  { %787 = vmatprep.subr.bf16.mxu1 %v1131_v5 }
  0xba   :  { %768 = vmatpush3.bf16.msra.mxu0 %v885_v11  ;;  %p1073_p2 = pnand %p1072_p1, %p1066_p8 }
  0xbb   :  { %769 = vmatprep.subr.bf16.mxu0 %v1131_v5 }
  0xbc   :  { %788 = vmatpush3.bf16.msra.mxu1 %v893_v16 }
  0xbd   :  { %789 = vmatprep.subr.bf16.mxu1 %v1131_v5 }
  0xbe   :  { %770 = vmatpush3.bf16.msra.mxu0 %v886_v13 }
  0xbf   :  { %771 = vmatprep.subr.bf16.mxu0 %v1131_v5 }
  0xc0   :  { %790 = vmatpush3.bf16.msra.mxu1 %v894_v20 }
  0xc1   :  { %791 = vmatprep.subr.bf16.mxu1 %v1131_v5 }
  0xc2   :  { %772 = vmatpush3.bf16.msra.mxu0 %v887_v15 }
  0xc3   :  { %773 = vmatprep.subr.bf16.mxu0 %v1131_v5 }
  0xc4   :  { %792 = vmatpush3.bf16.msra.mxu1 %v895_v22 }
  0xc5   :  { %793 = vmatprep.subr.bf16.mxu1 %v1131_v5 }
  0xc6   :  { %774 = vmatpush3.bf16.msra.mxu0 %v888_v17 }
  0xc7   :  { %799 = vmatprep.subr.bf16.mxu0 %v1131_v5 }
  0xc8   :  { %794 = vmatpush3.bf16.msra.mxu1 %v896_v23 }
  0xc9   :  { %776 = vmatmul.mubr.bf16.vlgmr.msra.gmra.mrb[0].mxu0 %v166_v21  ;;  %819 = vmatprep.subr.bf16.mxu1 %v1131_v5 }
  0xca   :  { %815 = vmatprep.mubr.msk.bf16.mxu0 %vm1132_vm0, %v1131_v5  ;;  %800 = vmatpush3.bf16.msra.mxu0 %v897_v24 }
  0xcb   :  { %801 = vmatprep.subr.bf16.mxu0 %v1131_v5 }
  0xce   :  { %802 = vmatpush3.bf16.msra.mxu0 %v898_v25 }
  0xcf   :  { %803 = vmatprep.subr.bf16.mxu0 %v1131_v5 }
  0xd2   :  { %804 = vmatpush3.bf16.msra.mxu0 %v899_v26 }
  0xd3   :  { %805 = vmatprep.subr.bf16.mxu0 %v1131_v5 }
  0xd6   :  { %806 = vmatpush3.bf16.msra.mxu0 %v900_v27 }
  0xd7   :  { %807 = vmatprep.subr.bf16.mxu0 %v1131_v5 }
  0xda   :  { %808 = vmatpush3.bf16.msra.mxu0 %v901_v28 }
  0xdb   :  { %809 = vmatprep.subr.bf16.mxu0 %v1131_v5 }
  0xde   :  { %810 = vmatpush3.bf16.msra.mxu0 %v902_v29 }
  0xdf   :  { %811 = vmatprep.subr.bf16.mxu0 %v1131_v5 }
  0xe2   :  { %812 = vmatpush3.bf16.msra.mxu0 %v903_v40 }
  0xe3   :  { %813 = vmatprep.subr.bf16.mxu0 %v1131_v5 }
  0xe6   :  { %814 = vmatpush3.bf16.msra.mxu0 %v904_v41 }
 0x19c   :  { %v272_v31 = vpop.f32.mrb[0].mxu0 }
 0x19d   :  { %v273_v32 = vadd.f32 %v685_v30, %v272_v31  ;;  %v777_v33 = vpop.f32.mrb[1].mxu0 }
 0x19e   :  { %v275_v34 = vpop.f32.mrb[2].mxu0 }
 0x19f   :  { %v276_v35 = vadd.f32 %v685_v30, %v275_v34  ;;  %v778_v36 = vpop.f32.mrb[3].mxu0  ;;  %v279_v37 = vmax.f32 %v273_v32, 0.0 }
 0x1a1   :  { %v280_v38 = vmax.f32 %v276_v35, 0.0 }
 0x1a3   :  { %v281_v39 = vpack.c.bf16 %v280_v38, %v279_v37 }
 0x1a5   :  { %796 = vmatmul.mubr.bf16.vlgmr.msra.gmra.mrb[0].mxu1 %v281_v39 }
 0x1a6   :  { %835 = vmatprep.mubr.msk.bf16.mxu1 %vm1132_vm0, %v1131_v5  ;;  %820 = vmatpush3.bf16.msra.mxu1 %v905_v42 }
 0x1a7   :  { %821 = vmatprep.subr.bf16.mxu1 %v1131_v5 }
 0x1aa   :  { %822 = vmatpush3.bf16.msra.mxu1 %v906_v43 }
 0x1ab   :  { %823 = vmatprep.subr.bf16.mxu1 %v1131_v5 }
 0x1ae   :  { %824 = vmatpush3.bf16.msra.mxu1 %v907_v44 }
 0x1af   :  { %825 = vmatprep.subr.bf16.mxu1 %v1131_v5 }
 0x1b2   :  { %826 = vmatpush3.bf16.msra.mxu1 %v908_v45 }
 0x1b3   :  { %827 = vmatprep.subr.bf16.mxu1 %v1131_v5 }
 0x1b6   :  { %828 = vmatpush3.bf16.msra.mxu1 %v909_v46 }
 0x1b7   :  { %829 = vmatprep.subr.bf16.mxu1 %v1131_v5 }
 0x1ba   :  { %830 = vmatpush3.bf16.msra.mxu1 %v910_v47 }
 0x1bb   :  { %831 = vmatprep.subr.bf16.mxu1 %v1131_v5 }
 0x1be   :  { %832 = vmatpush3.bf16.msra.mxu1 %v911_v58 }
 0x1bf   :  { %833 = vmatprep.subr.bf16.mxu1 %v1131_v5  ;;  %v712_v5 = vld [vmem:[%s1419_s9] ss:$0 sm:$0xff] }
 0x1c2   :  { %834 = vmatpush3.bf16.msra.mxu1 %v912_v59 }
 0x278   :  { %v387_v49 = vpop.f32.mrb[0].mxu1 }
 0x279   :  { %v388_v50 = vadd.f32 %v694_v48, %v387_v49  ;;  %v797_v51 = vpop.f32.mrb[1].mxu1 }
 0x27a   :  { %v390_v52 = vpop.f32.mrb[2].mxu1 }
 0x27b   :  { %v391_v53 = vadd.f32 %v694_v48, %v390_v52  ;;  %v798_v54 = vpop.f32.mrb[3].mxu1  ;;  %v394_v55 = vmax.f32 %v388_v50, 0.0 }
 0x27d   :  { %v395_v56 = vmax.f32 %v391_v53, 0.0 }
 0x27f   :  { %v396_v57 = vpack.c.bf16 %v395_v56, %v394_v55 }
 0x281   :  { %816 = vmatmul.mubr.bf16.vlgmr.msra.gmra.mrb[4].mxu0 %v396_v57 }
 0x354   :  { %v502_v61 = vpop.f32.mrb[4].mxu0 }
 0x355   :  { %v503_v62 = vadd.f32 %v703_v60, %v502_v61  ;;  %v817_v63 = vpop.f32.mrb[5].mxu0 }
 0x356   :  { %v505_v0 = vpop.f32.mrb[6].mxu0 }
 0x357   :  { %v506_v1 = vadd.f32 %v703_v60, %v505_v0  ;;  %v818_v2 = vpop.f32.mrb[7].mxu0  ;;  %v509_v3 = vmax.f32 %v503_v62, 0.0 }
 0x359   :  { %v510_v4 = vmax.f32 %v506_v1, 0.0 }
 0x35b   :  { %v511_v6 = vpack.c.bf16 %v510_v4, %v509_v3 }
 0x35d   :  { %836 = vmatmul.mubr.bf16.vlgmr.msra.gmra.mrb[4].mxu1 %v511_v6 }
 0x430   :  { %v617_v7 = vpop.f32.mrb[4].mxu1 }
 0x431   :  { %v618_v8 = vadd.f32 %v712_v5, %v617_v7  ;;  %v837_v9 = vpop.f32.mrb[5].mxu1 }
 0x432   :  { %v620_v10 = vpop.f32.mrb[6].mxu1 }
 0x433   :  { %624 = vst [vmem:[#allocation15] sm:$0xff] %v618_v8  ;;  %v621_v11 = vadd.f32 %v712_v5, %v620_v10  ;;  %v838_v12 = vpop.f32.mrb[7].mxu1 }
 0x435   :  { %625 = vst [vmem:[#allocation15 + $0x8] sm:$0xff] %v621_v11 }
 0x436   :  { %1076 = shalt.err (!%p1073_p2)
}
 0x437   :  { %s1077_s29 = scalar_lea.hbm %s1420_s10, 256 }
 0x438   :  { %p1078_p3 = scmp.ne.s32.totalorder %s1420_s10, %s1077_s29  ;;  %p1081_p4 = scmp.lt.u32.totalorder %s1077_s29, %s1420_s10 }
 0x43a   :  { %p1083_p5 = pnand %p1081_p4, %p1078_p3 }
 0x43c   :  { %1086 = shalt.err (!%p1083_p5)
}
 0x43d   :  { %s1134_s14 = smov 128   ;;  %s1135_s20 = smov 8  }
 0x43e   :  { %637 = dma.vmem_to_hbm [thread:$0]  %s632_s19, 256, %s1420_s10, [#allocation9], %s1134_s14, %s1134_s14, %s1135_s20  }
 0x43f   :  { %1109 = dma.done.wait [#allocation9], 256  }
 0x440   :  { %1110 = vsyncadd [#allocation9], 4294967040 }
 0x441   :  { %641 = vsyncpa [#allocation8], 1 }
 0x442   :  { %642 = vsyncpa [#allocation11], 1 }
 0x443   :  { %643 = vsyncpa [#allocation14], 1 }
 0x444   :  { %644 = vsyncpa [#allocation9], 1 }
 0x445   :  { %645 = vsyncmov [#allocation3] }
 0x448   :  { %s646_s17 = vpop.sfrf %645 }
 0x449   :  { %p721_p6 = scmp.ne.s32.totalorder %s646_s17, 0 }
 0x44b   :  { %650 = shalt.err (%p721_p6)  }
 0x44c   :  { %652 = vsyncmov [#allocation3 + $0x1] }
 0x44f   :  { %s653_s18 = vpop.sfrf %652 }
 0x450   :  { %p722_p9 = scmp.ne.s32.totalorder %s653_s18, 0 }
 0x452   :  { %657 = shalt.err (%p722_p9)  }

</bundles_post_ra>
